<compile_context>
chip_gen: v5e
topology: v5e:2x2
jax: 0.10.0
libtpu: 0.0.40
codegen_flags: <defaults>
</compile_context>

<pallas_src>
import functools
import math

import jax
import jax.numpy as jnp
import numpy as np
from jax.experimental import pallas as pl
from jax.experimental.pallas import tpu as pltpu

D_MODEL = 32
NUM_HEADS = 4
D_FF = 64
D_K = D_MODEL // NUM_HEADS
LN_EPS = 1e-5


def encoder_layer_kernel(x_ref, wqkv_ref, wo_ref, w1_ref, w2_ref, bias_ref,
                         o_ref, *, batch, seq):
    x = x_ref[...]                                     # (B*S, D)
    slab = bias_ref[...]                               # (8, 96) packed vectors

    b_qkv = slab[0:1, :3 * D_MODEL]                    # (1, 96)
    b_o = slab[1:2, :D_MODEL]
    g1 = slab[2:3, :D_MODEL]
    be1 = slab[3:4, :D_MODEL]
    b_1 = slab[4:5, :D_FF]
    b_2 = slab[5:6, :D_MODEL]
    g2 = slab[6:7, :D_MODEL]
    be2 = slab[7:8, :D_MODEL]

    # --- fused QKV projection: one MXU push instead of three ---
    qkv = jnp.dot(x, wqkv_ref[...], preferred_element_type=jnp.float32) + b_qkv
    q = qkv[:, :D_MODEL]
    k = qkv[:, D_MODEL:2 * D_MODEL]
    v = qkv[:, 2 * D_MODEL:]

    def to_heads(t):  # (B*S, D) -> (B*H, S, D_K): single relayout per tensor
        return (t.reshape(batch, seq, NUM_HEADS, D_K)
                 .transpose(0, 2, 1, 3)
                 .reshape(batch * NUM_HEADS, seq, D_K))

    qh = to_heads(q)
    kh = to_heads(k)
    vh = to_heads(v)

    # scores[n, i, j] = <q[n, i], k[n, j]> / sqrt(d_k)   (one batched dot_general)
    scores = jax.lax.dot_general(
        qh, kh, (((2,), (2,)), ((0,), (0,))),
        preferred_element_type=jnp.float32) * (1.0 / math.sqrt(D_K))  # (B*H, S, S)

    # NOTE: the reference applies softmax over dim=1 of (B, H, Sq, Sk) — i.e. across
    # the *heads* axis, NOT the key axis.  Reproduce exactly, with an EXACT divide
    # (approx reciprocal was the source of the previous numerical failure).
    s4 = scores.reshape(batch, NUM_HEADS, seq, seq)
    m = jnp.max(s4, axis=1, keepdims=True)
    e = jnp.exp(s4 - m)
    denom = jnp.sum(e, axis=1, keepdims=True)
    probs = (e / denom).reshape(batch * NUM_HEADS, seq, seq)

    # ctx[n] = probs[n] @ V[n]   (one batched dot_general)
    ctx = jax.lax.dot_general(
        probs, vh, (((2,), (1,)), ((0,), (0,))),
        preferred_element_type=jnp.float32)            # (B*H, S, D_K)

    # combine heads -> (B*S, H*D_K) and do ONE output-projection matmul
    # (head-sum happens inside the MXU accumulator, no VPU reduction).
    ctx = (ctx.reshape(batch, NUM_HEADS, seq, D_K)
              .transpose(0, 2, 1, 3)
              .reshape(batch * seq, D_MODEL))
    attn = jnp.dot(ctx, wo_ref[...], preferred_element_type=jnp.float32) + b_o

    # --- residual + LayerNorm1 ---
    y = x + attn
    mu = jnp.mean(y, axis=-1, keepdims=True)
    var = jnp.mean((y - mu) ** 2, axis=-1, keepdims=True)
    y = (y - mu) * jax.lax.rsqrt(var + LN_EPS) * g1 + be1

    # --- position-wise feed-forward ---
    h1 = jnp.dot(y, w1_ref[...], preferred_element_type=jnp.float32) + b_1
    h1 = jnp.maximum(h1, 0.0)
    ff = jnp.dot(h1, w2_ref[...], preferred_element_type=jnp.float32) + b_2

    # --- residual + LayerNorm2 ---
    z = y + ff
    mu2 = jnp.mean(z, axis=-1, keepdims=True)
    var2 = jnp.mean((z - mu2) ** 2, axis=-1, keepdims=True)
    z = (z - mu2) * jax.lax.rsqrt(var2 + LN_EPS) * g2 + be2

    o_ref[...] = z.astype(o_ref.dtype)


def encoder_layer(x, params):
    (wq, bq, wk, bk, wv, bv, wo, bo,
     g1, be1, w1, b1, w2, b2, g2, be2) = params
    B, S, D = x.shape

    # Host-side layout prep (cheap, done outside the kernel):
    #  * fold batch into rows
    #  * fuse QKV weights/biases
    #  * pack all tiny bias / LayerNorm vectors into one (8, 96) slab
    xf = x.reshape(B * S, D)
    w_qkv = jnp.concatenate([wq, wk, wv], axis=1)                    # (D, 3D)
    b_qkv = jnp.concatenate([bq, bk, bv], axis=1)                    # (1, 3D)

    width = 3 * D_MODEL

    def row(vec):
        vec = vec.reshape(1, -1)
        return jnp.pad(vec, ((0, 0), (0, width - vec.shape[1])))

    bias_slab = jnp.concatenate(
        [row(b_qkv), row(bo), row(g1), row(be1),
         row(b1), row(b2), row(g2), row(be2)], axis=0)               # (8, 96)

    vmem = pl.BlockSpec(memory_space=pltpu.MemorySpace.VMEM)
    out = pl.pallas_call(
        functools.partial(encoder_layer_kernel, batch=B, seq=S),
        out_shape=jax.ShapeDtypeStruct((B * S, D), x.dtype),
        in_specs=[vmem] * 6,
        out_specs=vmem,
    )(xf, w_qkv, wo, w1, w2, bias_slab)
    return out.reshape(B, S, D)


# ------------------------- pure-JAX reference -------------------------
def layernorm_ref(t, g, b):
    mu = jnp.mean(t, axis=-1, keepdims=True)
    var = jnp.mean((t - mu) ** 2, axis=-1, keepdims=True)
    return (t - mu) * jax.lax.rsqrt(var + LN_EPS) * g + b


def ref_forward(x, params):
    P = jax.lax.Precision.HIGHEST
    (wq, bq, wk, bk, wv, bv, wo, bo,
     g1, be1, w1, b1, w2, b2, g2, be2) = params
    B, S, D = x.shape

    def split(t):  # (B, S, D) -> (B, H, S, d_k)
        return t.reshape(B, S, NUM_HEADS, D_K).transpose(0, 2, 1, 3)

    Q = split(jnp.dot(x, wq, precision=P) + bq)
    K = split(jnp.dot(x, wk, precision=P) + bk)
    V = split(jnp.dot(x, wv, precision=P) + bv)
    scores = jnp.einsum('bhsd,bhtd->bhst', Q, K, precision=P) / math.sqrt(D_K)
    # softmax over dim=1 (the heads axis), exactly as the torch reference
    m = jnp.max(scores, axis=1, keepdims=True)
    e = jnp.exp(scores - m)
    probs = e / jnp.sum(e, axis=1, keepdims=True)
    out = jnp.einsum('bhst,bhtd->bhsd', probs, V, precision=P)
    out = out.transpose(0, 2, 1, 3).reshape(B, S, D)
    attn = jnp.dot(out, wo, precision=P) + bo
    y = layernorm_ref(x + attn, g1, be1)
    h1 = jnp.maximum(jnp.dot(y, w1, precision=P) + b1, 0.0)
    ff = jnp.dot(h1, w2, precision=P) + b2
    return layernorm_ref(y + ff, g2, be2)


def make_params(key):
    keys = jax.random.split(key, 8)

    def lin(k, fan_in, fan_out):
        # weight returned pre-transposed: (in, out); bias as (1, out)
        w = jax.random.normal(k, (fan_in, fan_out), jnp.float32) * 0.1
        b = jnp.zeros((1, fan_out), jnp.float32) + 0.01
        return w, b

    wq, bq = lin(keys[0], D_MODEL, D_MODEL)
    wk, bk = lin(keys[1], D_MODEL, D_MODEL)
    wv, bv = lin(keys[2], D_MODEL, D_MODEL)
    wo, bo = lin(keys[3], D_MODEL, D_MODEL)
    w1, b1 = lin(keys[4], D_MODEL, D_FF)
    w2, b2 = lin(keys[5], D_FF, D_MODEL)
    g1 = jnp.ones((1, D_MODEL), jnp.float32)
    be1 = jnp.zeros((1, D_MODEL), jnp.float32)
    g2 = jnp.ones((1, D_MODEL), jnp.float32)
    be2 = jnp.zeros((1, D_MODEL), jnp.float32)
    return (wq, bq, wk, bk, wv, bv, wo, bo,
            g1, be1, w1, b1, w2, b2, g2, be2)


if __name__ == "__main__":
    key = jax.random.PRNGKey(0)
    kx, kp = jax.random.split(key)
    B, S = 2, 8
    x = jax.random.normal(kx, (B, S, D_MODEL), jnp.float32)
    params = make_params(kp)

    out = encoder_layer(x, params)
    out = jax.block_until_ready(out)

    ref = ref_forward(x, params)
    np.testing.assert_allclose(np.asarray(out), np.asarray(ref),
                               rtol=2e-4, atol=2e-4)
    print("KERNEL_OK")
</pallas_src>

<mosaic_0001>
module attributes {stable_mosaic.version = 11 : i64} {
  func.func @encoder_layer_kernel(%arg0: memref<16x32xf32, #tpu.memory_space<vmem>>, %arg1: memref<32x96xf32, #tpu.memory_space<vmem>>, %arg2: memref<32x32xf32, #tpu.memory_space<vmem>>, %arg3: memref<32x64xf32, #tpu.memory_space<vmem>>, %arg4: memref<64x32xf32, #tpu.memory_space<vmem>>, %arg5: memref<8x96xf32, #tpu.memory_space<vmem>>, %arg6: memref<16x32xf32, #tpu.memory_space<vmem>>) attributes {dimension_semantics = [], scalar_prefetch = 0 : i64, scratch_operands = 0 : i64, tpu.core_type = #tpu.core_type<tc>} {
    %c0 = arith.constant 0 : index
    %c0_0 = arith.constant 0 : index
    %0 = vector.load %arg0[%c0, %c0_0] : memref<16x32xf32, #tpu.memory_space<vmem>>, vector<16x32xf32>
    %c0_1 = arith.constant 0 : index
    %c0_2 = arith.constant 0 : index
    %1 = vector.load %arg5[%c0_1, %c0_2] : memref<8x96xf32, #tpu.memory_space<vmem>>, vector<8x96xf32>
    %2 = vector.extract_strided_slice %1 {offsets = [0, 0], sizes = [1, 96], strides = [1, 1]} : vector<8x96xf32> to vector<1x96xf32>
    %3 = vector.extract_strided_slice %1 {offsets = [1, 0], sizes = [1, 32], strides = [1, 1]} : vector<8x96xf32> to vector<1x32xf32>
    %4 = vector.extract_strided_slice %1 {offsets = [2, 0], sizes = [1, 32], strides = [1, 1]} : vector<8x96xf32> to vector<1x32xf32>
    %5 = vector.extract_strided_slice %1 {offsets = [3, 0], sizes = [1, 32], strides = [1, 1]} : vector<8x96xf32> to vector<1x32xf32>
    %6 = vector.extract_strided_slice %1 {offsets = [4, 0], sizes = [1, 64], strides = [1, 1]} : vector<8x96xf32> to vector<1x64xf32>
    %7 = vector.extract_strided_slice %1 {offsets = [5, 0], sizes = [1, 32], strides = [1, 1]} : vector<8x96xf32> to vector<1x32xf32>
    %8 = vector.extract_strided_slice %1 {offsets = [6, 0], sizes = [1, 32], strides = [1, 1]} : vector<8x96xf32> to vector<1x32xf32>
    %9 = vector.extract_strided_slice %1 {offsets = [7, 0], sizes = [1, 32], strides = [1, 1]} : vector<8x96xf32> to vector<1x32xf32>
    %c0_3 = arith.constant 0 : index
    %c0_4 = arith.constant 0 : index
    %10 = vector.load %arg1[%c0_3, %c0_4] : memref<32x96xf32, #tpu.memory_space<vmem>>, vector<32x96xf32>
    %cst = arith.constant dense<0.000000e+00> : vector<16x96xf32>
    %11 = tpu.matmul %0, %10, %cst {dimension_numbers = #tpu.dot_dimension_numbers<[1], [0], [0], [1], [0, 0, 1, 1], [], []>} : vector<16x32xf32>, vector<32x96xf32>, vector<16x96xf32> -> vector<16x96xf32>
    %12 = vector.broadcast %2 : vector<1x96xf32> to vector<16x96xf32>
    %13 = arith.addf %11, %12 : vector<16x96xf32>
    %14 = vector.extract_strided_slice %13 {offsets = [0, 0], sizes = [16, 32], strides = [1, 1]} : vector<16x96xf32> to vector<16x32xf32>
    %15 = vector.extract_strided_slice %13 {offsets = [0, 32], sizes = [16, 32], strides = [1, 1]} : vector<16x96xf32> to vector<16x32xf32>
    %16 = vector.extract_strided_slice %13 {offsets = [0, 64], sizes = [16, 32], strides = [1, 1]} : vector<16x96xf32> to vector<16x32xf32>
    %17 = vector.shape_cast %14 : vector<16x32xf32> to vector<2x8x4x8xf32>
    %18 = tpu.transpose %17, [0, 2, 1, 3] : vector<2x8x4x8xf32> -> vector<2x4x8x8xf32>
    %19 = vector.shape_cast %18 : vector<2x4x8x8xf32> to vector<8x8x8xf32>
    %20 = vector.shape_cast %15 : vector<16x32xf32> to vector<2x8x4x8xf32>
    %21 = tpu.transpose %20, [0, 2, 1, 3] : vector<2x8x4x8xf32> -> vector<2x4x8x8xf32>
    %22 = vector.shape_cast %21 : vector<2x4x8x8xf32> to vector<8x8x8xf32>
    %23 = vector.shape_cast %16 : vector<16x32xf32> to vector<2x8x4x8xf32>
    %24 = tpu.transpose %23, [0, 2, 1, 3] : vector<2x8x4x8xf32> -> vector<2x4x8x8xf32>
    %25 = vector.shape_cast %24 : vector<2x4x8x8xf32> to vector<8x8x8xf32>
    %cst_5 = arith.constant dense<0.000000e+00> : vector<8x8x8xf32>
    %26 = tpu.matmul %19, %22, %cst_5 {dimension_numbers = #tpu.dot_dimension_numbers<[2], [2], [1], [1], [0, 0, 0, 1, 1, 1], [0], [0]>} : vector<8x8x8xf32>, vector<8x8x8xf32>, vector<8x8x8xf32> -> vector<8x8x8xf32>
    %cst_6 = arith.constant 0.353553385 : f32
    %27 = vector.broadcast %cst_6 : f32 to vector<8x8x8xf32>
    %28 = arith.mulf %26, %27 : vector<8x8x8xf32>
    %29 = vector.shape_cast %28 : vector<8x8x8xf32> to vector<2x4x8x8xf32>
    %cst_7 = arith.constant dense<0xFF800000> : vector<2x8x8xf32>
    %30 = vector.multi_reduction <maximumf>, %29, %cst_7 [1] : vector<2x4x8x8xf32> to vector<2x8x8xf32>
    %31 = vector.shape_cast %30 : vector<2x8x8xf32> to vector<2x1x8x8xf32>
    %32 = vector.broadcast %31 : vector<2x1x8x8xf32> to vector<2x4x8x8xf32>
    %33 = arith.subf %29, %32 : vector<2x4x8x8xf32>
    %34 = math.exp %33 : vector<2x4x8x8xf32>
    %cst_8 = arith.constant dense<0.000000e+00> : vector<2x8x8xf32>
    %35 = vector.multi_reduction <add>, %34, %cst_8 [1] : vector<2x4x8x8xf32> to vector<2x8x8xf32>
    %36 = vector.shape_cast %35 : vector<2x8x8xf32> to vector<2x1x8x8xf32>
    %37 = vector.broadcast %36 : vector<2x1x8x8xf32> to vector<2x4x8x8xf32>
    %38 = arith.divf %34, %37 : vector<2x4x8x8xf32>
    %39 = vector.shape_cast %38 : vector<2x4x8x8xf32> to vector<8x8x8xf32>
    %cst_9 = arith.constant dense<0.000000e+00> : vector<8x8x8xf32>
    %40 = tpu.matmul %39, %25, %cst_9 {dimension_numbers = #tpu.dot_dimension_numbers<[2], [1], [1], [2], [0, 0, 0, 1, 1, 2], [0], [0]>} : vector<8x8x8xf32>, vector<8x8x8xf32>, vector<8x8x8xf32> -> vector<8x8x8xf32>
    %41 = vector.shape_cast %40 : vector<8x8x8xf32> to vector<2x4x8x8xf32>
    %42 = tpu.transpose %41, [0, 2, 1, 3] : vector<2x4x8x8xf32> -> vector<2x8x4x8xf32>
    %43 = vector.shape_cast %42 : vector<2x8x4x8xf32> to vector<16x32xf32>
    %c0_10 = arith.constant 0 : index
    %c0_11 = arith.constant 0 : index
    %44 = vector.load %arg2[%c0_10, %c0_11] : memref<32x32xf32, #tpu.memory_space<vmem>>, vector<32x32xf32>
    %cst_12 = arith.constant dense<0.000000e+00> : vector<16x32xf32>
    %45 = tpu.matmul %43, %44, %cst_12 {dimension_numbers = #tpu.dot_dimension_numbers<[1], [0], [0], [1], [0, 0, 1, 1], [], []>} : vector<16x32xf32>, vector<32x32xf32>, vector<16x32xf32> -> vector<16x32xf32>
    %46 = vector.broadcast %3 : vector<1x32xf32> to vector<16x32xf32>
    %47 = arith.addf %45, %46 : vector<16x32xf32>
    %48 = arith.addf %0, %47 : vector<16x32xf32>
    %cst_13 = arith.constant dense<0.000000e+00> : vector<16xf32>
    %49 = vector.multi_reduction <add>, %48, %cst_13 [1] : vector<16x32xf32> to vector<16xf32>
    %50 = vector.shape_cast %49 : vector<16xf32> to vector<16x1xf32>
    %cst_14 = arith.constant 3.200000e+01 : f32
    %51 = vector.broadcast %cst_14 : f32 to vector<16x1xf32>
    %52 = arith.divf %50, %51 : vector<16x1xf32>
    %53 = vector.broadcast %52 : vector<16x1xf32> to vector<16x32xf32>
    %54 = arith.subf %48, %53 : vector<16x32xf32>
    %55 = arith.mulf %54, %54 : vector<16x32xf32>
    %cst_15 = arith.constant dense<0.000000e+00> : vector<16xf32>
    %56 = vector.multi_reduction <add>, %55, %cst_15 [1] : vector<16x32xf32> to vector<16xf32>
    %57 = vector.shape_cast %56 : vector<16xf32> to vector<16x1xf32>
    %cst_16 = arith.constant 3.200000e+01 : f32
    %58 = vector.broadcast %cst_16 : f32 to vector<16x1xf32>
    %59 = arith.divf %57, %58 : vector<16x1xf32>
    %60 = vector.broadcast %52 : vector<16x1xf32> to vector<16x32xf32>
    %61 = arith.subf %48, %60 : vector<16x32xf32>
    %cst_17 = arith.constant 9.99999974E-6 : f32
    %62 = vector.broadcast %cst_17 : f32 to vector<16x1xf32>
    %63 = arith.addf %59, %62 : vector<16x1xf32>
    %64 = math.rsqrt %63 : vector<16x1xf32>
    %65 = vector.broadcast %64 : vector<16x1xf32> to vector<16x32xf32>
    %66 = arith.mulf %61, %65 : vector<16x32xf32>
    %67 = vector.broadcast %4 : vector<1x32xf32> to vector<16x32xf32>
    %68 = arith.mulf %66, %67 : vector<16x32xf32>
    %69 = vector.broadcast %5 : vector<1x32xf32> to vector<16x32xf32>
    %70 = arith.addf %68, %69 : vector<16x32xf32>
    %c0_18 = arith.constant 0 : index
    %c0_19 = arith.constant 0 : index
    %71 = vector.load %arg3[%c0_18, %c0_19] : memref<32x64xf32, #tpu.memory_space<vmem>>, vector<32x64xf32>
    %cst_20 = arith.constant dense<0.000000e+00> : vector<16x64xf32>
    %72 = tpu.matmul %70, %71, %cst_20 {dimension_numbers = #tpu.dot_dimension_numbers<[1], [0], [0], [1], [0, 0, 1, 1], [], []>} : vector<16x32xf32>, vector<32x64xf32>, vector<16x64xf32> -> vector<16x64xf32>
    %73 = vector.broadcast %6 : vector<1x64xf32> to vector<16x64xf32>
    %74 = arith.addf %72, %73 : vector<16x64xf32>
    %cst_21 = arith.constant 0.000000e+00 : f32
    %75 = vector.broadcast %cst_21 : f32 to vector<16x64xf32>
    %76 = arith.maximumf %74, %75 : vector<16x64xf32>
    %c0_22 = arith.constant 0 : index
    %c0_23 = arith.constant 0 : index
    %77 = vector.load %arg4[%c0_22, %c0_23] : memref<64x32xf32, #tpu.memory_space<vmem>>, vector<64x32xf32>
    %cst_24 = arith.constant dense<0.000000e+00> : vector<16x32xf32>
    %78 = tpu.matmul %76, %77, %cst_24 {dimension_numbers = #tpu.dot_dimension_numbers<[1], [0], [0], [1], [0, 0, 1, 1], [], []>} : vector<16x64xf32>, vector<64x32xf32>, vector<16x32xf32> -> vector<16x32xf32>
    %79 = vector.broadcast %7 : vector<1x32xf32> to vector<16x32xf32>
    %80 = arith.addf %78, %79 : vector<16x32xf32>
    %81 = arith.addf %70, %80 : vector<16x32xf32>
    %cst_25 = arith.constant dense<0.000000e+00> : vector<16xf32>
    %82 = vector.multi_reduction <add>, %81, %cst_25 [1] : vector<16x32xf32> to vector<16xf32>
    %83 = vector.shape_cast %82 : vector<16xf32> to vector<16x1xf32>
    %cst_26 = arith.constant 3.200000e+01 : f32
    %84 = vector.broadcast %cst_26 : f32 to vector<16x1xf32>
    %85 = arith.divf %83, %84 : vector<16x1xf32>
    %86 = vector.broadcast %85 : vector<16x1xf32> to vector<16x32xf32>
    %87 = arith.subf %81, %86 : vector<16x32xf32>
    %88 = arith.mulf %87, %87 : vector<16x32xf32>
    %cst_27 = arith.constant dense<0.000000e+00> : vector<16xf32>
    %89 = vector.multi_reduction <add>, %88, %cst_27 [1] : vector<16x32xf32> to vector<16xf32>
    %90 = vector.shape_cast %89 : vector<16xf32> to vector<16x1xf32>
    %cst_28 = arith.constant 3.200000e+01 : f32
    %91 = vector.broadcast %cst_28 : f32 to vector<16x1xf32>
    %92 = arith.divf %90, %91 : vector<16x1xf32>
    %93 = vector.broadcast %85 : vector<16x1xf32> to vector<16x32xf32>
    %94 = arith.subf %81, %93 : vector<16x32xf32>
    %cst_29 = arith.constant 9.99999974E-6 : f32
    %95 = vector.broadcast %cst_29 : f32 to vector<16x1xf32>
    %96 = arith.addf %92, %95 : vector<16x1xf32>
    %97 = math.rsqrt %96 : vector<16x1xf32>
    %98 = vector.broadcast %97 : vector<16x1xf32> to vector<16x32xf32>
    %99 = arith.mulf %94, %98 : vector<16x32xf32>
    %100 = vector.broadcast %8 : vector<1x32xf32> to vector<16x32xf32>
    %101 = arith.mulf %99, %100 : vector<16x32xf32>
    %102 = vector.broadcast %9 : vector<1x32xf32> to vector<16x32xf32>
    %103 = arith.addf %101, %102 : vector<16x32xf32>
    %c0_30 = arith.constant 0 : index
    %c0_31 = arith.constant 0 : index
    %104 = vector.load %arg6[%c0_30, %c0_31] : memref<16x32xf32, #tpu.memory_space<vmem>>, vector<16x32xf32>
    tpu.vector_store %arg6[%c0_30, %c0_31], %103 {strides = array<i32>} : memref<16x32xf32, #tpu.memory_space<vmem>>, vector<16x32xf32>,
    return
  }
}

</mosaic_0001>

<bundles_post_ra>
// kernel: tpu_custom_call.1
= control target key start
LH: loop header
LB: loop body
LE: loop exit
PB: predicated region body
PF: predicated region fallthrough
CT: control target
= control target key end

     0   :  { %11 = vsyncpa [#allocation3], 0  ;;  %s2695_s0 = inlined_call_operand.hbm [shape: f32[16,32], index: 0, kind: input, shape index: {}]   ;;  %s2696_s1 = inlined_call_operand.vmem [shape: f32[32,96], index: 1, kind: input, shape index: {}]   ;;  %s2697_s2 = inlined_call_operand.vmem [shape: f32[32,32], index: 2, kind: input, shape index: {}]   ;;  %s2698_s3 = inlined_call_operand.vmem [shape: f32[32,64], index: 3, kind: input, shape index: {}]   ;;  %s2699_s4 = inlined_call_operand.vmem [shape: f32[64,32], index: 4, kind: input, shape index: {}]   ;;  %s2700_s5 = inlined_call_operand.hbm [shape: f32[8,96], index: 5, kind: input, shape index: {}]   ;;  %s2701_s6 = inlined_call_operand.hbm [shape: f32[16,32], index: 6, kind: output, shape index: {}]  }
   0x1   :  { %12 = vsyncpa [#allocation6], 0 }
   0x2   :  { %13 = vsyncpa [#allocation4], 0  ;;  %s18_s23 = sshll.u32 %s2695_s0, 4  ;;  %s1982_s24 = smov [#allocation2]   ;;  %s19_s23 = int_to_ptr.hbm [resolvable:$true] %s18_s23 }
   0x3   :  { %s20_s25 = sshll.u32 %s1982_s24, 4  ;;  %s40_s28 = sshll.u32 %s2700_s5, 4  ;;  %s21_s25 = int_to_ptr.vmem [resolvable:$true] %s20_s25  ;;  %s41_s28 = int_to_ptr.hbm [resolvable:$true] %s40_s28 }
   0x4   :  { %s1983_s29 = smov 128   ;;  %s1984_s30 = smov 8  }
   0x5   :  { %26 = dma.hbm_to_vmem [thread:$0]  %s19_s23, 256, %s21_s25, [#allocation3], %s1983_s29, %s1983_s29, %s1984_s30  }
   0x6   :  { %s1985_s7 = smov [#allocation5]  }
   0x7   :  { %s42_s8 = sshll.u32 %s1985_s7, 4  ;;  %s43_s8 = int_to_ptr.vmem [resolvable:$true] %s42_s8 }
   0x8   :  { %45 = dma.hbm_to_vmem [thread:$0]  %s41_s28, 128, %s43_s8, [#allocation6]  }
   0x9   :  { %1976 = dma.done.wait [#allocation3], 256  }
   0xa   :  { %1977 = vsyncadd [#allocation3], 4294967040 }
   0xb   :  { %1978 = dma.done.wait [#allocation6], 128  }
   0xc   :  { %1979 = vsyncadd [#allocation6], 4294967168  ;;  %v60_v0 = vld [vmem:[%s2696_s1 + $0x18] sm:$0xff]  ;;  %v59_v1 = vld [vmem:[%s2696_s1 + $0x10] sm:$0xff]  ;;  %vm62_vm0 = vcmask 261120   ;;  %s1986_s15 = smov 104  }
   0xd   :  { %81 = vmatpush.msra.mxu0 %v60_v0  ;;  %v58_v2 = vld [vmem:[%s2696_s1 + $0x8] sm:$0xff]  ;;  %v57_v3 = vld [vmem:[%s2696_s1] sm:$0xff]  ;;  %v56_v6 = vld [vmem:[#allocation5] sm:$0xff]  ;;  %s1987_s16 = smov 120   ;;  %s1988_s1 = smov 112   ;;  %vm113_vm1 = vcmask 1047556  }
   0xe   :  { %v54_v4 = vld [vmem:[#allocation2] sm:$0xff]  ;;  %v55_v5 = vld [vmem:[#allocation2 + $0x8] sm:$0xff]  ;;  %v61_v7 = vperm.slane %v56_v6, 0  ;;  %s1989_s17 = smov 96   ;;  %v1990_v14 = vmov 1983009808  }
   0xf   :  { %82 = vmatpush.msra.mxu0 %v59_v1  ;;  %v118_v15 = vunpack.c.l.s4 %v1990_v14  ;;  %v1991_v23 = vmov 1934713408   ;;  %s1992_s18 = smov 64   ;;  %vm821_vm2 = vcmask 64512   ;;  %s1993_s19 = smov 24   ;;  %vm1556_vm11 = vcmask 130048  }
  0x10   :  { %v142_v24 = vunpack.c.l.s4 %v1991_v23  ;;  %s1994_s20 = smov 16   ;;  %vm1559_vm12 = vcmask 195584  }
  0x11   :  { %83 = vmatpush.msra.mxu0 %v58_v2  ;;  %v2076_v20 = vunpack.c.0.s8 %v118_v15 }
  0x12   :  { %v2090_v32 = vunpack.c.0.s8 %v142_v24 }
  0x13   :  { %84 = vmatpush.msra.mxu0 %v57_v3 }
  0x14   :  { %1804 = vmatmul.msk.f32.vlgmr.msra.gmra.mxu0 %vm62_vm0, %v54_v4 }
  0x1c   :  { %1805 = vmatmul.msk.f32.gmra.mxu0 %vm62_vm0, %v55_v5 }
  0x91   :  { %v86_v8 = vpop.f32.mrf.mxu0 }
  0x92   :  { %v2055_v9 = vadd.f32 %v86_v8, %v61_v7 }
  0x94   :  { %106 = vrot.lane.b32.xlu1 %v2055_v9, %s1986_s15  ;;  %94 = vrot.lane.b32.xlu0 %v2055_v9, %s1987_s16  ;;  %v115_v25 = vrot.slane %v2055_v9, 4 }
  0x99   :  { %v89_v10 = vpop.f32.mrf.mxu0 }
  0x9a   :  { %v2059_v11 = vadd.f32 %v89_v10, %v61_v7 }
  0x9c   :  { %102 = vrot.lane.b32.xlu2 %v2059_v11, %s1988_s1  ;;  %96 = vrot.lane.b32.xlu1 %v2059_v11, %s1987_s16 }
  0x9d   :  { %100 = vrot.lane.b32.xlu0 %v2055_v9, %s1988_s1 }
  0xa4   :  { %108 = vrot.lane.b32.xlu2 %v2059_v11, %s1986_s15 }
  0xa5   :  { %333 = vrot.lane.b32.xlu0 %v2055_v9, %s1989_s17 }
  0xf6   :  { %v2079_v22 = vpop.permute.xlu2 %102 }
  0xfe   :  { %v2097_v40 = vpop.permute.xlu2 %108 }
 0x106   :  { %v107_v12 = vpop.permute.xlu1 %106  ;;  %v2067_v13 = vpop.permute.xlu0 %94 }
 0x107   :  { %v125_v16 = vrot.slane %v107_v12, 4  ;;  %v127_v17 = vrot.slane %v2067_v13, 4  ;;  %345 = vrot.lane.b32.xlu0 %v107_v12, %s1989_s17  ;;  %337 = vrot.lane.b32.xlu1 %v2067_v13, %s1989_s17  ;;  %v1851_v61 = vpack.i.bf16 %v2067_v13, %v2055_v9 }
 0x109   :  { %v126_v18 = vsel %vm113_vm1, %v125_v16, %v2067_v13  ;;  %v128_v19 = vsel %vm113_vm1, %v107_v12, %v127_v17 }
 0x10a   :  { %v136_v21 = vperm.slane %v128_v19, %v2076_v20  ;;  %v132_v26 = vperm.slane %v126_v18, %v2076_v20  ;;  %v1866_v18 = vpack.i.bf16 %v2097_v40, %v2079_v22 }
 0x10c   :  { %v149_v30 = vrot.slane %v136_v21, 4  ;;  %v137_v34 = vrot.slane %v132_v26, 4 }
 0x10e   :  { %v97_v44 = vpop.permute.xlu1 %96 }
 0x10f   :  { %v101_v27 = vpop.permute.xlu0 %100  ;;  %343 = vrot.lane.b32.xlu0 %v2079_v22, %s1989_s17  ;;  %335 = vrot.lane.b32.xlu1 %v2059_v11, %s1989_s17  ;;  %v1861_v54 = vpack.i.bf16 %v97_v44, %v2059_v11 }
 0x110   :  { %v112_v28 = vrot.slane %v101_v27, 4  ;;  %v116_v29 = vsel %vm113_vm1, %v101_v27, %v115_v25  ;;  %341 = vrot.lane.b32.xlu2 %v101_v27, %s1989_s17  ;;  %v1856_v39 = vpack.i.bf16 %v107_v12, %v101_v27 }
 0x111   :  { %v124_v31 = vperm.slane %v116_v29, %v2076_v20  ;;  %v169_v29 = vrot.slane %v2079_v22, 4 }
 0x112   :  { %v114_v33 = vsel %vm113_vm1, %v112_v28, %v2055_v9 }
 0x113   :  { %v120_v35 = vperm.slane %v114_v33, %v2076_v20  ;;  %v150_v36 = vsel %vm113_vm1, %v149_v30, %v124_v31  ;;  %v151_v37 = vrot.slane %v124_v31, 4  ;;  %v171_v30 = vrot.slane %v2059_v11, 4 }
 0x114   :  { %v156_v43 = vperm.slane %v150_v36, %v2090_v32  ;;  %v183_v31 = vrot.slane %v97_v44, 4 }
 0x115   :  { %v138_v38 = vsel %vm113_vm1, %v137_v34, %v120_v35  ;;  %v139_v41 = vrot.slane %v120_v35, 4  ;;  %v152_v42 = vsel %vm113_vm1, %v136_v21, %v151_v37  ;;  %v172_v33 = vsel %vm113_vm1, %v2079_v22, %v171_v30 }
 0x116   :  { %v144_v45 = vperm.slane %v138_v38, %v2090_v32  ;;  %v160_v47 = vperm.slane %v152_v42, %v2090_v32  ;;  %v165_v49 = vrot.slane %v156_v43, 4  ;;  %v181_v34 = vrot.slane %v2097_v40, 4 }
 0x117   :  { %347 = vrot.lane.b32.xlu1 %v2097_v40, %s1989_s17  ;;  %1857 = vrot.lane.b32.xlu0 %v1856_v39, %s1992_s18  ;;  %v140_v46 = vsel %vm113_vm1, %v132_v26, %v139_v41  ;;  %v170_v35 = vsel %vm113_vm1, %v169_v29, %v2059_v11  ;;  %v184_v36 = vsel %vm113_vm1, %v2097_v40, %v183_v31 }
 0x118   :  { %339 = vrot.lane.b32.xlu2 %v97_v44, %s1989_s17  ;;  %v148_v48 = vperm.slane %v140_v46, %v2090_v32  ;;  %v167_v50 = vrot.slane %v160_v47, 4  ;;  %v161_v51 = vrot.slane %v144_v45, 4  ;;  %v166_v60 = vsel %vm113_vm1, 0.0, %v165_v49 }
 0x119   :  { %v180_v37 = vperm.slane %v172_v33, %v2076_v20  ;;  %v182_v38 = vsel %vm113_vm1, %v181_v34, %v97_v44  ;;  %v176_v39 = vperm.slane %v170_v35, %v2076_v20  ;;  %v192_v41 = vperm.slane %v184_v36, %v2076_v20 }
 0x11a   :  { %v163_v52 = vrot.slane %v148_v48, 4  ;;  %v168_v53 = vsel %vm113_vm1, 0.0, %v167_v50  ;;  %v236_v55 = vsel %vm113_vm1, %v167_v50, %v156_v43  ;;  %v162_v0 = vsel %vm113_vm1, 0.0, %v161_v51 }
 0x11b   :  { %v241_v56 = vrot.slane %v168_v53, 4  ;;  %v240_v59 = vperm.slane %v236_v55, %v2076_v20  ;;  %v207_v42 = vrot.slane %v180_v37, 4  ;;  %v188_v43 = vperm.slane %v182_v38, %v2076_v20 }
 0x11c   :  { %v164_v57 = vsel %vm113_vm1, 0.0, %v163_v52  ;;  %v225_v58 = vsel %vm113_vm1, %v163_v52, %v144_v45  ;;  %v195_v22 = vrot.slane %v176_v39, 4  ;;  %v205_v45 = vrot.slane %v192_v41, 4 }
 0x11d   :  { %v229_v62 = vperm.slane %v225_v58, %v2076_v20  ;;  %v230_v63 = vrot.slane %v164_v57, 4  ;;  %v242_v1 = vsel %vm113_vm1, %v241_v56, %v166_v60  ;;  %v261_v2 = vrot.slane %v240_v59, 4 }
 0x11e   :  { %v246_v4 = vperm.slane %v242_v1, %v2076_v20  ;;  %v208_v46 = vsel %vm113_vm1, %v192_v41, %v207_v42  ;;  %v193_v47 = vrot.slane %v188_v43, 4  ;;  %v196_v11 = vsel %vm113_vm1, %v188_v43, %v195_v22 }
 0x11f   :  { %1862 = vrot.lane.b32.xlu1 %v1861_v54, %s1992_s18  ;;  %v231_v3 = vsel %vm113_vm1, %v230_v63, %v162_v0  ;;  %v249_v5 = vrot.slane %v229_v62, 4  ;;  %v216_v40 = vperm.slane %v208_v46, %v2090_v32  ;;  %v206_v48 = vsel %vm113_vm1, %v205_v45, %v180_v37 }
 0x120   :  { %1852 = vrot.lane.b32.xlu2 %v1851_v61, %s1992_s18  ;;  %v235_v6 = vperm.slane %v231_v3, %v2076_v20  ;;  %v262_v7 = vsel %vm113_vm1, %v246_v4, %v261_v2  ;;  %v259_v8 = vrot.slane %v246_v4, 4  ;;  %v204_v44 = vperm.slane %v196_v11, %v2090_v32 }
 0x121   :  { %v270_v10 = vperm.slane %v262_v7, %v2090_v32  ;;  %v194_v49 = vsel %vm113_vm1, %v193_v47, %v176_v39  ;;  %v212_v50 = vperm.slane %v206_v48, %v2090_v32  ;;  %v223_v51 = vrot.slane %v216_v40, 4 }
 0x122   :  { %v250_v9 = vsel %vm113_vm1, %v235_v6, %v249_v5  ;;  %v247_v12 = vrot.slane %v235_v6, 4  ;;  %v260_v14 = vsel %vm113_vm1, %v259_v8, %v240_v59  ;;  %v200_v52 = vperm.slane %v194_v49, %v2090_v32  ;;  %v334_v6 = vpop.permute.xlu0 %333 }
 0x123   :  { %v258_v13 = vperm.slane %v250_v9, %v2090_v32  ;;  %v275_v15 = vrot.slane %v270_v10, 4  ;;  %v266_v17 = vperm.slane %v260_v14, %v2090_v32  ;;  %v219_v53 = vrot.slane %v204_v44, 4 }
 0x124   :  { %v248_v16 = vsel %vm113_vm1, %v247_v12, %v229_v62  ;;  %v224_v54 = vsel %vm113_vm1, 0.0, %v223_v51  ;;  %v221_v55 = vrot.slane %v212_v50, 4  ;;  %v217_v56 = vrot.slane %v200_v52, 4 }
 0x125   :  { %v277_v19 = vrot.slane %v258_v13, 4  ;;  %v254_v21 = vperm.slane %v248_v16, %v2090_v32  ;;  %v2137_v23 = vsel %vm113_vm1, %v275_v15, %v258_v13  ;;  %v271_v24 = vrot.slane %v266_v17, 4 }
 0x126   :  { %v220_v57 = vsel %vm113_vm1, 0.0, %v219_v53  ;;  %v295_v58 = vrot.slane %v224_v54, 4  ;;  %v290_v59 = vsel %vm113_vm1, %v223_v51, %v212_v50  ;;  %v222_v60 = vsel %vm113_vm1, 0.0, %v221_v55 }
 0x127   :  { %v2141_v25 = vsel %vm113_vm1, %v270_v10, %v277_v19  ;;  %v273_v26 = vrot.slane %v254_v21, 4  ;;  %v2144_v27 = vsel %vm113_vm1, %v271_v24, %v254_v21  ;;  %v284_v61 = vrot.slane %v220_v57, 4 }
 0x128   :  { %1867 = vrot.lane.b32.xlu2 %v1866_v18, %s1992_s18  ;;  %v218_v63 = vsel %vm113_vm1, 0.0, %v217_v56  ;;  %v294_v0 = vperm.slane %v290_v59, %v2076_v20  ;;  %v296_v1 = vsel %vm113_vm1, %v295_v58, %v222_v60  ;;  %v279_v2 = vsel %vm113_vm1, %v219_v53, %v200_v52 }
 0x129   :  { %v2147_v28 = vsel %vm113_vm1, %v266_v17, %v273_v26  ;;  %v285_v3 = vsel %vm113_vm1, %v284_v61, %v218_v63  ;;  %v300_v4 = vperm.slane %v296_v1, %v2076_v20  ;;  %v283_v7 = vperm.slane %v279_v2, %v2076_v20 }
 0x12a   :  { %v315_v5 = vrot.slane %v294_v0, 4  ;;  %v289_v8 = vperm.slane %v285_v3, %v2076_v20  ;;  %v359_v13 = vrot.slane %v334_v6, 4 }
 0x12b   :  { %v303_v15 = vrot.slane %v283_v7, 4  ;;  %v313_v19 = vrot.slane %v300_v4, 4 }
 0x12c   :  { %v316_v12 = vsel %vm113_vm1, %v300_v4, %v315_v5  ;;  %v301_v14 = vrot.slane %v289_v8, 4 }
 0x12d   :  { %v2189_v18 = vperm.slane %v316_v12, %v2090_v32  ;;  %v304_v30 = vsel %vm113_vm1, %v289_v8, %v303_v15  ;;  %v314_v37 = vsel %vm113_vm1, %v313_v19, %v294_v0 }
 0x12e   :  { %v302_v31 = vsel %vm113_vm1, %v301_v14, %v283_v7  ;;  %v2202_v41 = vperm.slane %v304_v30, %v2090_v32  ;;  %v2214_v11 = vperm.slane %v314_v37, %v2090_v32 }
 0x12f   :  { %v329_v36 = vrot.slane %v2189_v18, 4  ;;  %v2205_v42 = vperm.slane %v302_v31, %v2090_v32 }
 0x131   :  { %v2211_v47 = vsel %vm113_vm1, %v329_v36, %v2202_v41  ;;  %v327_v53 = vrot.slane %v2205_v42, 4 }
 0x16a   :  { %v342_v62 = vpop.permute.xlu2 %341 }
 0x16b   :  { %v357_v9 = vrot.slane %v342_v62, 4  ;;  %v360_v17 = vsel %vm113_vm1, %v342_v62, %v359_v13 }
 0x16c   :  { %v368_v24 = vperm.slane %v360_v17, %v2076_v20 }
 0x16d   :  { %v358_v16 = vsel %vm113_vm1, %v357_v9, %v334_v6 }
 0x16e   :  { %v364_v21 = vperm.slane %v358_v16, %v2076_v20  ;;  %v395_v22 = vrot.slane %v368_v24, 4 }
 0x170   :  { %v383_v43 = vrot.slane %v364_v21, 4 }
 0x172   :  { %v2183_v10 = vpop.permute.xlu2 %339 }
 0x173   :  { %v427_v50 = vrot.slane %v2183_v10, 4 }
 0x179   :  { %v338_v26 = vpop.permute.xlu1 %337  ;;  %v346_v29 = vpop.permute.xlu0 %345 }
 0x17a   :  { %v371_v33 = vrot.slane %v338_v26, 4  ;;  %v2195_v34 = vpop.permute.xlu2 %1852  ;;  %v369_v35 = vrot.slane %v346_v29, 4 }
 0x17b   :  { %v1855_v54 = vunpack.i.h.bf16 %v2195_v34  ;;  %v1854_v55 = vunpack.i.l.bf16 %v2195_v34 }
 0x17c   :  { %v370_v38 = vsel %vm113_vm1, %v369_v35, %v338_v26  ;;  %v372_v39 = vsel %vm113_vm1, %v346_v29, %v371_v33 }
 0x17d   :  { %v376_v45 = vperm.slane %v370_v38, %v2076_v20  ;;  %v380_v46 = vperm.slane %v372_v39, %v2076_v20  ;;  %v615_v9 = vrot.slane %v1855_v54, 4  ;;  %v603_v12 = vrot.slane %v1854_v55, 4 }
 0x17f   :  { %v381_v40 = vrot.slane %v376_v45, 4  ;;  %v384_v48 = vsel %vm113_vm1, %v376_v45, %v383_v43  ;;  %v393_v44 = vrot.slane %v380_v46, 4  ;;  %v396_v49 = vsel %vm113_vm1, %v380_v46, %v395_v22 }
 0x180   :  { %v392_v51 = vperm.slane %v384_v48, %v2090_v32  ;;  %v404_v52 = vperm.slane %v396_v49, %v2090_v32 }
 0x181   :  { %v382_v56 = vsel %vm113_vm1, %v381_v40, %v364_v21  ;;  %v394_v57 = vsel %vm113_vm1, %v393_v44, %v368_v24  ;;  %v336_v58 = vpop.permute.xlu1 %335  ;;  %v344_v59 = vpop.permute.xlu0 %343 }
 0x182   :  { %v388_v60 = vperm.slane %v382_v56, %v2090_v32  ;;  %v400_v61 = vperm.slane %v394_v57, %v2090_v32  ;;  %v407_v62 = vrot.slane %v392_v51, 4  ;;  %v411_v63 = vrot.slane %v404_v52, 4  ;;  %v2228_v0 = vpop.permute.xlu2 %1867 }
 0x183   :  { %v415_v1 = vrot.slane %v336_v58, 4  ;;  %v1870_v2 = vunpack.i.h.bf16 %v2228_v0  ;;  %v1869_v3 = vunpack.i.l.bf16 %v2228_v0  ;;  %v413_v4 = vrot.slane %v344_v59, 4 }
 0x184   :  { %v408_v5 = vsel %vm113_vm1, 0.0, %v407_v62  ;;  %v409_v6 = vrot.slane %v400_v61, 4  ;;  %v412_v7 = vsel %vm113_vm1, 0.0, %v411_v63  ;;  %v480_v8 = vsel %vm113_vm1, %v411_v63, %v400_v61 }
 0x185   :  { %v2236_v13 = vperm.slane %v480_v8, %v2076_v20  ;;  %v485_v14 = vrot.slane %v412_v7, 4  ;;  %v474_v16 = vrot.slane %v408_v5, 4  ;;  %v414_v17 = vsel %vm113_vm1, %v413_v4, %v336_v58 }
 0x186   :  { %v410_v15 = vsel %vm113_vm1, 0.0, %v409_v6  ;;  %v416_v19 = vsel %vm113_vm1, %v344_v59, %v415_v1  ;;  %v420_v21 = vperm.slane %v414_v17, %v2076_v20  ;;  %v405_v26 = vrot.slane %v388_v60, 4 }
 0x187   :  { %v424_v24 = vperm.slane %v416_v19, %v2076_v20  ;;  %v469_v29 = vsel %vm113_vm1, %v407_v62, %v388_v60  ;;  %v2246_v30 = vrot.slane %v1870_v2, 4  ;;  %v2250_v31 = vrot.slane %v1869_v3, 4 }
 0x188   :  { %v2253_v33 = vperm.slane %v469_v29, %v2076_v20  ;;  %v486_v34 = vsel %vm113_vm1, %v485_v14, %v410_v15  ;;  %v439_v35 = vrot.slane %v420_v21, 4  ;;  %v406_v39 = vsel %vm113_vm1, 0.0, %v405_v26 }
 0x189   :  { %v451_v36 = vrot.slane %v424_v24, 4  ;;  %v348_v37 = vpop.permute.xlu1 %347  ;;  %v1858_v38 = vpop.permute.xlu0 %1857  ;;  %v505_v43 = vrot.slane %v2236_v13, 4  ;;  %v475_v44 = vsel %vm113_vm1, %v474_v16, %v406_v39  ;;  %v2262_v49 = vperm.slane %v486_v34, %v2076_v20 }
 0x18a   :  { %v425_v22 = vrot.slane %v348_v37, 4  ;;  %v428_v45 = vsel %vm113_vm1, %v348_v37, %v427_v50  ;;  %v1860_v46 = vunpack.i.h.bf16 %v1858_v38  ;;  %v1859_v40 = vunpack.i.l.bf16 %v1858_v38 }
 0x18b   :  { %v436_v48 = vperm.slane %v428_v45, %v2076_v20  ;;  %v493_v51 = vrot.slane %v2253_v33, 4 }
 0x18c   :  { %v426_v52 = vsel %vm113_vm1, %v425_v22, %v2183_v10  ;;  %v613_v56 = vrot.slane %v1860_v46, 4  ;;  %v616_v57 = vsel %vm113_vm1, %v1860_v46, %v615_v9  ;;  %v601_v58 = vrot.slane %v1859_v40, 4 }
 0x18d   :  { %v432_v50 = vperm.slane %v426_v52, %v2076_v20  ;;  %v449_v59 = vrot.slane %v436_v48, 4  ;;  %v452_v60 = vsel %vm113_vm1, %v436_v48, %v451_v36  ;;  %v624_v61 = vperm.slane %v616_v57, %v2076_v20 }
 0x18e   :  { %v460_v62 = vperm.slane %v452_v60, %v2090_v32  ;;  %v614_v63 = vsel %vm113_vm1, %v613_v56, %v1855_v54  ;;  %v602_v1 = vsel %vm113_vm1, %v601_v58, %v1854_v55  ;;  %v604_v4 = vsel %vm113_vm1, %v1859_v40, %v603_v12 }
 0x18f   :  { %v437_v10 = vrot.slane %v432_v50, 4  ;;  %v440_v5 = vsel %vm113_vm1, %v432_v50, %v439_v35  ;;  %v450_v6 = vsel %vm113_vm1, %v449_v59, %v424_v24  ;;  %v620_v7 = vperm.slane %v614_v63, %v2076_v20 }
 0x190   :  { %v448_v8 = vperm.slane %v440_v5, %v2090_v32  ;;  %v456_v9 = vperm.slane %v450_v6, %v2090_v32  ;;  %v467_v14 = vrot.slane %v460_v62, 4  ;;  %v637_v15 = vrot.slane %v624_v61, 4 }
 0x191   :  { %v438_v16 = vsel %vm113_vm1, %v437_v10, %v420_v21  ;;  %v625_v54 = vrot.slane %v620_v7, 4  ;;  %v608_v55 = vperm.slane %v602_v1, %v2076_v20  ;;  %v612_v12 = vperm.slane %v604_v4, %v2076_v20  ;;  %v1863_v22 = vpop.permute.xlu1 %1862 }
 0x192   :  { %v2284_v17 = vperm.slane %v438_v16, %v2090_v32  ;;  %v2286_v19 = vrot.slane %v448_v8, 4  ;;  %v465_v24 = vrot.slane %v456_v9, 4  ;;  %v2289_v26 = vsel %vm113_vm1, 0.0, %v467_v14 }
 0x193   :  { %v534_v29 = vsel %vm113_vm1, %v467_v14, %v456_v9  ;;  %v626_v34 = vsel %vm113_vm1, %v625_v54, %v608_v55  ;;  %v627_v21 = vrot.slane %v608_v55, 4  ;;  %v506_v35 = vsel %vm113_vm1, %v2262_v49, %v505_v43 }
 0x194   :  { %v461_v36 = vrot.slane %v2284_v17, 4  ;;  %v2298_v37 = vsel %vm113_vm1, 0.0, %v2286_v19  ;;  %v2301_v38 = vsel %vm113_vm1, 0.0, %v465_v24  ;;  %v539_v39 = vrot.slane %v2289_v26, 4 }
 0x195   :  { %v2305_v45 = vperm.slane %v534_v29, %v2076_v20  ;;  %v628_v46 = vsel %vm113_vm1, %v620_v7, %v627_v21  ;;  %v2309_v40 = vperm.slane %v626_v34, %v2090_v32  ;;  %v638_v43 = vsel %vm113_vm1, %v637_v15, %v612_v12 }
 0x196   :  { %v636_v48 = vperm.slane %v628_v46, %v2090_v32  ;;  %v639_v52 = vrot.slane %v612_v12, 4  ;;  %v644_v56 = vperm.slane %v638_v43, %v2090_v32  ;;  %v479_v57 = vperm.slane %v475_v44, %v2076_v20 }
 0x197   :  { %v528_v58 = vrot.slane %v2298_v37, 4  ;;  %v514_v50 = vperm.slane %v506_v35, %v2090_v32  ;;  %v1865_v59 = vunpack.i.h.bf16 %v1863_v22  ;;  %v1864_v60 = vunpack.i.l.bf16 %v1863_v22 }
 0x198   :  { %v640_v62 = vsel %vm113_vm1, %v624_v61, %v639_v52  ;;  %v2318_v63 = vrot.slane %v636_v48, 4  ;;  %v653_v1 = vrot.slane %v644_v56, 4  ;;  %v494_v4 = vsel %vm113_vm1, %v479_v57, %v493_v51 }
 0x199   :  { %v648_v10 = vperm.slane %v640_v62, %v2090_v32  ;;  %v502_v5 = vperm.slane %v494_v4, %v2090_v32  ;;  %v519_v6 = vrot.slane %v514_v50, 4  ;;  %v671_v7 = vrot.slane %v1865_v59, 4 }
 0x19a   :  { %v649_v44 = vrot.slane %v2309_v40, 4  ;;  %v2326_v8 = vsel %vm113_vm1, 0.0, %v2318_v63  ;;  %v658_v61 = vsel %vm113_vm1, %v2250_v31, %v1864_v60  ;;  %v659_v9 = vrot.slane %v1864_v60, 4 }
 0x19b   :  { %v2331_v14 = vsel %vm113_vm1, 0.0, %v653_v1  ;;  %v655_v51 = vrot.slane %v648_v10, 4  ;;  %v520_v15 = vsel %vm113_vm1, %v519_v6, %v502_v5  ;;  %v521_v16 = vrot.slane %v502_v5, 4 }
 0x19c   :  { %1810 = vmatpush.xpose.msk.msra.mxu3 %vm821_vm2, %v520_v15  ;;  %v660_v54 = vsel %vm113_vm1, %v1869_v3, %v659_v9  ;;  %v664_v55 = vperm.slane %v658_v61, %v2076_v20  ;;  %v670_v12 = vsel %vm113_vm1, %v2246_v30, %v1865_v59  ;;  %v672_v31 = vsel %vm113_vm1, %v1870_v2, %v671_v7 }
 0x19d   :  { %v656_v24 = vsel %vm113_vm1, 0.0, %v655_v51  ;;  %v718_v29 = vrot.slane %v2326_v8, 4  ;;  %v522_v34 = vsel %vm113_vm1, %v514_v50, %v521_v16  ;;  %v668_v21 = vperm.slane %v660_v54, %v2076_v20 }
 0x19e   :  { %v724_v35 = vsel %vm113_vm1, %v655_v51, %v644_v56  ;;  %1812 = vmatpush.xpose.msk.msra.mxu1 %vm821_vm2, %v522_v34  ;;  %v676_v3 = vperm.slane %v670_v12, %v2076_v20  ;;  %v680_v30 = vperm.slane %v672_v31, %v2076_v20  ;;  %v683_v37 = vrot.slane %v664_v55, 4 }
 0x19f   :  { %v695_v0 = vrot.slane %v668_v21, 4  ;;  %v491_v22 = vrot.slane %v479_v57, 4  ;;  %v503_v2 = vrot.slane %v2262_v49, 4  ;;  %1811 = vmatmul.msk.f32.vlgmr.msra.gmra.mxu3 %vm821_vm2, %v2137_v23  ;;  %v462_v46 = vsel %vm113_vm1, 0.0, %v461_v36 }
 0x1a0   :  { %v681_v43 = vrot.slane %v676_v3, 4  ;;  %v684_v48 = vsel %vm113_vm1, %v676_v3, %v683_v37  ;;  %v693_v52 = vrot.slane %v680_v30, 4  ;;  %v523_v56 = vsel %vm113_vm1, %v2286_v19, %v2284_v17 }
 0x1a1   :  { %v692_v50 = vperm.slane %v684_v48, %v2090_v32  ;;  %v696_v59 = vsel %vm113_vm1, %v680_v30, %v695_v0  ;;  %v492_v49 = vsel %vm113_vm1, %v491_v22, %v2253_v33  ;;  %v504_v23 = vsel %vm113_vm1, %v503_v2, %v2236_v13  ;;  %1813 = vmatmul.msk.f32.vlgmr.msra.gmra.mxu1 %vm821_vm2, %v2141_v25 }
 0x1a2   :  { %v682_v36 = vsel %vm113_vm1, %v681_v43, %v664_v55  ;;  %v694_v57 = vsel %vm113_vm1, %v693_v52, %v668_v21  ;;  %v704_v60 = vperm.slane %v696_v59, %v2090_v32  ;;  %v498_v17 = vperm.slane %v492_v49, %v2090_v32 }
 0x1a3   :  { %v2373_v19 = vperm.slane %v682_v36, %v2090_v32  ;;  %v2376_v62 = vperm.slane %v694_v57, %v2090_v32  ;;  %v2378_v33 = vrot.slane %v692_v50, 4  ;;  %v510_v13 = vperm.slane %v504_v23, %v2090_v32 }
 0x1a4   :  { %v2381_v1 = vrot.slane %v704_v60, 4  ;;  %v517_v25 = vrot.slane %v498_v17, 4  ;;  %v527_v4 = vperm.slane %v523_v56, %v2076_v20  ;;  %v529_v10 = vsel %vm113_vm1, %v528_v58, %v462_v46 }
 0x1a5   :  { %v729_v5 = vrot.slane %v656_v24, 4  ;;  %v705_v6 = vrot.slane %v2373_v19, 4  ;;  %v708_v7 = vsel %vm113_vm1, 0.0, %v2378_v33  ;;  %v515_v61 = vrot.slane %v510_v13, 4 }
 0x1a6   :  { %v709_v9 = vrot.slane %v2376_v62, 4  ;;  %v2391_v51 = vsel %vm113_vm1, 0.0, %v2381_v1  ;;  %v518_v15 = vsel %vm113_vm1, %v510_v13, %v517_v25  ;;  %v533_v16 = vperm.slane %v529_v10, %v2076_v20 }
 0x1a7   :  { %v706_v54 = vsel %vm113_vm1, 0.0, %v705_v6  ;;  %v772_v58 = vrot.slane %v708_v7, 4  ;;  %v516_v55 = vsel %vm113_vm1, %v515_v61, %v498_v17  ;;  %v540_v12 = vsel %vm113_vm1, %v539_v39, %v2301_v38 }
 0x1a8   :  { %1806 = vmatpush.xpose.msk.msra.mxu2 %vm821_vm2, %v516_v55  ;;  %v544_v31 = vperm.slane %v540_v12, %v2076_v20  ;;  %v545_v24 = vrot.slane %v533_v16, 4  ;;  %v547_v34 = vrot.slane %v527_v4, 4  ;;  %v559_v21 = vrot.slane %v2305_v45, 4 }
 0x1a9   :  { %v650_v3 = vsel %vm113_vm1, 0.0, %v649_v44  ;;  %v713_v26 = vsel %vm113_vm1, %v2318_v63, %v2309_v40  ;;  %v728_v38 = vperm.slane %v724_v35, %v2076_v20  ;;  %v730_v39 = vsel %vm113_vm1, %v729_v5, %v2331_v14 }
 0x1aa   :  { %v548_v30 = vsel %vm113_vm1, %v533_v16, %v547_v34  ;;  %v557_v37 = vrot.slane %v544_v31, 4  ;;  %v560_v0 = vsel %vm113_vm1, %v544_v31, %v559_v21  ;;  %v546_v22 = vsel %vm113_vm1, %v545_v24, %v527_v4 }
 0x1ab   :  { %1807 = vmatmul.msk.f32.vlgmr.msra.gmra.mxu2 %vm821_vm2, %v2144_v27  ;;  %v556_v44 = vperm.slane %v548_v30, %v2090_v32  ;;  %v568_v2 = vperm.slane %v560_v0, %v2090_v32  ;;  %v552_v40 = vperm.slane %v546_v22, %v2090_v32  ;;  %v717_v63 = vperm.slane %v713_v26, %v2076_v20 }
 0x1ac   :  { %1808 = vmatpush.xpose.msk.msrb.mxu2 %vm821_vm2, %v518_v15  ;;  %v558_v14 = vsel %vm113_vm1, %v557_v37, %v2305_v45  ;;  %v719_v35 = vsel %vm113_vm1, %v718_v29, %v650_v3  ;;  %v734_v46 = vperm.slane %v730_v39, %v2076_v20  ;;  %v749_v43 = vrot.slane %v728_v38, 4 }
 0x1ad   :  { %v573_v48 = vrot.slane %v568_v2, 4  ;;  %v575_v27 = vrot.slane %v556_v44, 4  ;;  %v564_v52 = vperm.slane %v558_v14, %v2090_v32  ;;  %v571_v56 = vrot.slane %v552_v40, 4 }
 0x1ae   :  { %v723_v50 = vperm.slane %v719_v35, %v2076_v20  ;;  %v737_v59 = vrot.slane %v717_v63, 4  ;;  %v750_v49 = vsel %vm113_vm1, %v734_v46, %v749_v43  ;;  %v747_v23 = vrot.slane %v734_v46, 4 }
 0x1af   :  { %v783_v45 = vrot.slane %v2391_v51, 4  ;;  %v574_v8 = vsel %vm113_vm1, %v573_v48, %v556_v44  ;;  %v569_v36 = vrot.slane %v564_v52, 4  ;;  %v572_v29 = vsel %vm113_vm1, %v564_v52, %v571_v56 }
 0x1b0   :  { %1818 = vmatpush.xpose.msk.msrb.mxu1 %vm821_vm2, %v574_v8  ;;  %1816 = vmatpush.xpose.msk.msrb.mxu3 %vm821_vm2, %v572_v29  ;;  %v738_v57 = vsel %vm113_vm1, %v723_v50, %v737_v59  ;;  %v758_v60 = vperm.slane %v750_v49, %v2090_v32  ;;  %v735_v17 = vrot.slane %v723_v50, 4  ;;  %v748_v13 = vsel %vm113_vm1, %v747_v23, %v728_v38 }
 0x1b1   :  { %v570_v25 = vsel %vm113_vm1, %v569_v36, %v552_v40  ;;  %v576_v4 = vsel %vm113_vm1, %v568_v2, %v575_v27  ;;  %v746_v10 = vperm.slane %v738_v57, %v2090_v32  ;;  %v754_v5 = vperm.slane %v748_v13, %v2090_v32 }
 0x1b2   :  { %1814 = vmatpush.xpose.msk.msra.mxu2 %vm821_vm2, %v570_v25  ;;  %v763_v6 = vrot.slane %v758_v60, 4  ;;  %v736_v7 = vsel %vm113_vm1, %v735_v17, %v717_v63  ;;  %v767_v61 = vsel %vm113_vm1, %v2378_v33, %v2373_v19  ;;  %v773_v51 = vsel %vm113_vm1, %v772_v58, %v706_v54 }
 0x1b3   :  { %1809 = vmatmul.msk.f32.vlgmr.msrb.gmra.mxu2 %vm821_vm2, %v2147_v28  ;;  %1819 = vmatmul.msk.f32.vlgmr.msrb.gmra.mxu1 %vm821_vm2, %v2211_v47  ;;  %v742_v15 = vperm.slane %v736_v7, %v2090_v32  ;;  %v759_v16 = vrot.slane %v754_v5, 4  ;;  %v328_v55 = vsel %vm113_vm1, %v2214_v11, %v327_v53  ;;  %v771_v12 = vperm.slane %v767_v61, %v2076_v20 }
 0x1b4   :  { %v764_v19 = vsel %vm113_vm1, %v763_v6, %v746_v10  ;;  %1817 = vmatmul.msk.f32.vlgmr.msrb.gmra.mxu3 %vm821_vm2, %v328_v55  ;;  %v710_v28 = vsel %vm113_vm1, 0.0, %v709_v9  ;;  %v777_v47 = vperm.slane %v773_v51, %v2076_v20  ;;  %v778_v33 = vsel %vm113_vm1, %v2381_v1, %v2376_v62 }
 0x1b5   :  { %1190 = vmatpush.msra.mxu1 %v764_v19  ;;  %v760_v53 = vsel %vm113_vm1, %v759_v16, %v742_v15  ;;  %v765_v54 = vrot.slane %v746_v10, 4  ;;  %v761_v58 = vrot.slane %v742_v15, 4  ;;  %v782_v31 = vperm.slane %v778_v33, %v2076_v20 }
 0x1b6   :  { %1820 = vmatpush.xpose.msk.msrb.mxu2 %vm821_vm2, %v576_v4  ;;  %1144 = vmatpush.msra.mxu3 %v760_v53  ;;  %v325_v24 = vrot.slane %v2214_v11, 4  ;;  %v784_v34 = vsel %vm113_vm1, %v783_v45, %v710_v28  ;;  %v789_v21 = vrot.slane %v777_v47, 4  ;;  %v791_v9 = vrot.slane %v771_v12, 4 }
 0x1b7   :  { %v762_v3 = vsel %vm113_vm1, %v754_v5, %v761_v58  ;;  %v788_v26 = vperm.slane %v784_v34, %v2076_v20  ;;  %v803_v38 = vrot.slane %v782_v31, 4  ;;  %v766_v39 = vsel %vm113_vm1, %v758_v60, %v765_v54 }
 0x1b8   :  { %1167 = vmatpush.msrb.mxu0 %v762_v3  ;;  %v790_v62 = vsel %vm113_vm1, %v789_v21, %v771_v12  ;;  %v792_v1 = vsel %vm113_vm1, %v777_v47, %v791_v9  ;;  %v326_v0 = vsel %vm113_vm1, %v325_v24, %v2205_v42  ;;  %v331_v35 = vrot.slane %v2202_v41, 4 }
 0x1b9   :  { %v796_v30 = vperm.slane %v790_v62, %v2090_v32  ;;  %v801_v37 = vrot.slane %v788_v26, 4  ;;  %v804_v11 = vsel %vm113_vm1, %v788_v26, %v803_v38  ;;  %v800_v40 = vperm.slane %v792_v1, %v2090_v32 }
 0x1ba   :  { %v812_v22 = vperm.slane %v804_v11, %v2090_v32  ;;  %v332_v52 = vsel %vm113_vm1, %v2189_v18, %v331_v35 }
 0x1bb   :  { %1815 = vmatmul.msk.f32.vlgmr.msra.gmra.mxu2 %vm821_vm2, %v326_v0  ;;  %v802_v44 = vsel %vm113_vm1, %v801_v37, %v782_v31  ;;  %v815_v2 = vrot.slane %v796_v30, 4  ;;  %v819_v48 = vrot.slane %v800_v40, 4 }
 0x1bc   :  { %1213 = vmatpush.msra.mxu2 %v766_v39  ;;  %v808_v63 = vperm.slane %v802_v44, %v2090_v32  ;;  %v817_v14 = vrot.slane %v812_v22, 4 }
 0x1bd   :  { %v820_v56 = vsel %vm113_vm1, %v812_v22, %v819_v48 }
 0x1be   :  { %v816_v46 = vsel %vm113_vm1, %v808_v63, %v815_v2  ;;  %v818_v43 = vsel %vm113_vm1, %v817_v14, %v800_v40  ;;  %v813_v42 = vrot.slane %v808_v63, 4 }
 0x1bf   :  { %1259 = vmatpush.msra.mxu0 %v816_v46  ;;  %1282 = vmatpush.msrb.mxu1 %v818_v43 }
 0x1c0   :  { %v814_v27 = vsel %vm113_vm1, %v813_v42, %v796_v30 }
 0x1c1   :  { %1236 = vmatpush.msrb.mxu3 %v814_v27 }
 0x1c3   :  { %1821 = vmatmul.msk.f32.vlgmr.msrb.gmra.mxu2 %vm821_vm2, %v332_v52 }
 0x1c4   :  { %1305 = vmatpush.msrb.mxu2 %v820_v56 }
 0x21e   :  { %v923_v50 = vpop.f32.mrf.mxu1 }
 0x21f   :  { %v1033_v23 = vmul.f32 0.35355338, %v923_v50 }
 0x221   :  { %v1042_v57 = vsel %vm821_vm2, %v1033_v23, -inf }
 0x222   :  { %v897_v59 = vpop.f32.mrf.mxu3 }
 0x223   :  { %v1032_v45 = vmul.f32 0.35355338, %v897_v59 }
 0x225   :  { %v1040_v60 = vsel %vm821_vm2, %v1032_v45, -inf }
 0x22e   :  { %v845_v41 = vpop.f32.mrf.mxu2 }
 0x22f   :  { %v1030_v49 = vmul.f32 0.35355338, %v845_v41 }
 0x230   :  { %v1001_v55 = vpop.f32.mrf.mxu1 }
 0x231   :  { %v1038_v36 = vsel %vm821_vm2, %v1030_v49, -inf  ;;  %v1036_v28 = vmul.f32 0.35355338, %v1001_v55 }
 0x232   :  { %v1041_v17 = vmax.f32 %v1038_v36, %v1040_v60 }
 0x233   :  { %v1047_v24 = vsel %vm821_vm2, %v1036_v28, -inf }
 0x236   :  { %v871_v8 = vpop.f32.mrf.mxu2 }
 0x237   :  { %v1031_v29 = vmul.f32 0.35355338, %v871_v8  ;;  %v975_v12 = vpop.f32.mrf.mxu3 }
 0x238   :  { %v1035_v47 = vmul.f32 0.35355338, %v975_v12 }
 0x239   :  { %v1039_v18 = vsel %vm821_vm2, %v1031_v29, -inf }
 0x23a   :  { %v1043_v13 = vmax.f32 %v1039_v18, %v1042_v57  ;;  %v1046_v21 = vsel %vm821_vm2, %v1035_v47, -inf }
 0x23c   :  { %v1044_v25 = vmax.f32 %v1041_v17, %v1043_v13 }
 0x23e   :  { %v1052_v4 = vsub.f32 %v1030_v49, %v1044_v25  ;;  %v1053_v10 = vsub.f32 %v1031_v29, %v1044_v25  ;;  %v1054_v5 = vsub.f32 %v1032_v45, %v1044_v25  ;;  %v1055_v6 = vsub.f32 %v1033_v23, %v1044_v25  ;;  %v949_v7 = vpop.f32.mrf.mxu2 }
 0x23f   :  { %v1034_v19 = vmul.f32 0.35355338, %v949_v7 }
 0x240   :  { %v1060_v61 = vmul.f32 1.442695, %v1052_v4  ;;  %v1062_v51 = vmul.f32 1.442695, %v1053_v10  ;;  %v1064_v15 = vmul.f32 1.442695, %v1054_v5 }
 0x241   :  { %v1066_v16 = vmul.f32 1.442695, %v1055_v6  ;;  %v1045_v53 = vsel %vm821_vm2, %v1034_v19, -inf }
 0x242   :  { %1871 = vpow2.f32 %v1060_v61  ;;  %v1048_v38 = vmax.f32 %v1045_v53, %v1047_v24 }
 0x243   :  { %1873 = vpow2.f32 %v1062_v51 }
 0x244   :  { %1875 = vpow2.f32 %v1064_v15 }
 0x245   :  { %1877 = vpow2.f32 %v1066_v16 }
 0x246   :  { %v1027_v33 = vpop.f32.mrf.mxu2 }
 0x247   :  { %v1037_v54 = vmul.f32 0.35355338, %v1027_v33 }
 0x248   :  { %v1872_v58 = vpop.eup %1871 }
 0x249   :  { %v1874_v31 = vpop.eup %1873  ;;  %v1076_v34 = vsel %vm821_vm2, %v1872_v58, 0.0  ;;  %v1049_v9 = vsel %vm821_vm2, %v1037_v54, -inf }
 0x24a   :  { %v1876_v3 = vpop.eup %1875  ;;  %v1077_v26 = vsel %vm821_vm2, %v1874_v31, 0.0  ;;  %v1050_v62 = vmax.f32 %v1046_v21, %v1049_v9 }
 0x24b   :  { %v1878_v1 = vpop.eup %1877  ;;  %v1078_v39 = vadd.f32 %v1077_v26, %v1076_v34  ;;  %v1079_v30 = vsel %vm821_vm2, %v1876_v3, 0.0 }
 0x24c   :  { %v1051_v37 = vmax.f32 %v1048_v38, %v1050_v62  ;;  %v1081_v0 = vsel %vm821_vm2, %v1878_v1, 0.0 }
 0x24d   :  { %v1080_v11 = vadd.f32 %v1079_v30, %v1078_v39 }
 0x24e   :  { %v1056_v22 = vsub.f32 %v1034_v19, %v1051_v37  ;;  %v1057_v44 = vsub.f32 %v1035_v47, %v1051_v37  ;;  %v1058_v2 = vsub.f32 %v1036_v28, %v1051_v37  ;;  %v1059_v40 = vsub.f32 %v1037_v54, %v1051_v37 }
 0x24f   :  { %v1082_v63 = vadd.f32 %v1081_v0, %v1080_v11 }
 0x250   :  { %v1068_v14 = vmul.f32 1.442695, %v1056_v22  ;;  %v1070_v35 = vmul.f32 1.442695, %v1057_v44  ;;  %v1072_v46 = vmul.f32 1.442695, %v1058_v2 }
 0x251   :  { %1879 = vrcp.f32 %v1082_v63  ;;  %v1074_v43 = vmul.f32 1.442695, %v1059_v40  ;;  %v1101_v36 = vand.u32 2147483648, %v1082_v63  ;;  %v1099_v57 = vand.u32 2147483647, %v1082_v63 }
 0x252   :  { %1881 = vpow2.f32 %v1068_v14  ;;  %vm1095_vm4 = vweird.f32 %v1082_v63 }
 0x253   :  { %1883 = vpow2.f32 %v1070_v35  ;;  %v1102_v25 = vor.u32 1.1754944e-38, %v1101_v36  ;;  %vm1100_vm6 = vcmp.eq.f32.partialorder %v1099_v57, 8.507059e+37 }
 0x254   :  { %1885 = vpow2.f32 %v1072_v46 }
 0x255   :  { %1887 = vpow2.f32 %v1074_v43 }
 0x257   :  { %v1880_v42 = vpop.eup %1879 }
 0x258   :  { %v1882_v48 = vpop.eup %1881  ;;  %v1091_v27 = vmul.f32 %v1880_v42, %v1082_v63  ;;  %vm1096_vm3 = vweird.f32 %v1880_v42 }
 0x259   :  { %v1884_v52 = vpop.eup %1883  ;;  %v1083_v56 = vsel %vm821_vm2, %v1882_v48, 0.0  ;;  %vm1097_vm5 = vmor %vm1095_vm4, %vm1096_vm3 }
 0x25a   :  { %v1886_v41 = vpop.eup %1885  ;;  %v1084_v50 = vsel %vm821_vm2, %v1884_v52, 0.0  ;;  %v1092_v59 = vsub.f32 1.0, %v1091_v27 }
 0x25b   :  { %v1888_v49 = vpop.eup %1887  ;;  %v1085_v23 = vadd.f32 %v1084_v50, %v1083_v56  ;;  %v1086_v45 = vsel %vm821_vm2, %v1886_v41, 0.0 }
 0x25c   :  { %v1093_v8 = vmul.f32 %v1880_v42, %v1092_v59  ;;  %v1088_v60 = vsel %vm821_vm2, %v1888_v49, 0.0 }
 0x25d   :  { %v1087_v29 = vadd.f32 %v1086_v45, %v1085_v23 }
 0x25e   :  { %v1094_v18 = vadd.f32 %v1880_v42, %v1093_v8 }
 0x25f   :  { %v1089_v17 = vadd.f32 %v1088_v60, %v1087_v29 }
 0x260   :  { %v1098_v13 = vsel %vm1097_vm5, %v1880_v42, %v1094_v18  ;;  %vm1700_vm5 = vcmask 523264  }
 0x261   :  { %1889 = vrcp.f32 %v1089_v17  ;;  %v1103_v4 = vsel %vm1100_vm6, %v1102_v25, %v1098_v13  ;;  %v1119_v16 = vand.u32 2147483648, %v1089_v17  ;;  %v1117_v12 = vand.u32 2147483647, %v1089_v17 }
 0x262   :  { %v1104_v10 = vmul.f32 %v1872_v58, %v1103_v4  ;;  %v1105_v5 = vmul.f32 %v1874_v31, %v1103_v4  ;;  %v1106_v6 = vmul.f32 %v1876_v3, %v1103_v4  ;;  %v1107_v7 = vmul.f32 %v1878_v1, %v1103_v4 }
 0x263   :  { %vm1113_vm8 = vweird.f32 %v1089_v17  ;;  %v1120_v28 = vor.u32 1.1754944e-38, %v1119_v16  ;;  %vm1118_vm10 = vcmp.eq.f32.partialorder %v1117_v12, 8.507059e+37 }
 0x264   :  { %1822 = vmatmul.msk.f32.vlgmr.msra.gmra.mxu3 %vm821_vm2, %v1104_v10  ;;  %1823 = vmatmul.msk.f32.vlgmr.msrb.gmra.mxu0 %vm821_vm2, %v1105_v5 }
 0x265   :  { %1824 = vmatmul.msk.f32.vlgmr.msra.gmra.mxu1 %vm821_vm2, %v1106_v6  ;;  %1825 = vmatmul.msk.f32.vlgmr.msra.gmra.mxu2 %vm821_vm2, %v1107_v7 }
 0x267   :  { %v1890_v61 = vpop.eup %1889 }
 0x268   :  { %v1109_v51 = vmul.f32 %v1890_v61, %v1089_v17  ;;  %vm1114_vm7 = vweird.f32 %v1890_v61 }
 0x269   :  { %vm1115_vm9 = vmor %vm1113_vm8, %vm1114_vm7 }
 0x26a   :  { %v1110_v15 = vsub.f32 1.0, %v1109_v51 }
 0x26c   :  { %v1111_v55 = vmul.f32 %v1890_v61, %v1110_v15 }
 0x26e   :  { %v1112_v19 = vadd.f32 %v1890_v61, %v1111_v55 }
 0x270   :  { %v1116_v47 = vsel %vm1115_vm9, %v1890_v61, %v1112_v19 }
 0x271   :  { %v1121_v33 = vsel %vm1118_vm10, %v1120_v28, %v1116_v47 }
 0x272   :  { %v1125_v53 = vmul.f32 %v1888_v49, %v1121_v33  ;;  %v1122_v54 = vmul.f32 %v1882_v48, %v1121_v33  ;;  %v1123_v58 = vmul.f32 %v1884_v52, %v1121_v33  ;;  %v1124_v31 = vmul.f32 %v1886_v41, %v1121_v33 }
 0x274   :  { %1826 = vmatmul.msk.f32.vlgmr.msrb.gmra.mxu3 %vm821_vm2, %v1122_v54  ;;  %1827 = vmatmul.msk.f32.vlgmr.msra.gmra.mxu0 %vm821_vm2, %v1123_v58 }
 0x275   :  { %1828 = vmatmul.msk.f32.vlgmr.msrb.gmra.mxu1 %vm821_vm2, %v1124_v31  ;;  %1829 = vmatmul.msk.f32.vlgmr.msrb.gmra.mxu2 %vm821_vm2, %v1125_v53 }
 0x2e1   :  { %v1169_v34 = vpop.f32.mrf.mxu0 }
 0x2e2   :  { %v1192_v24 = vpop.f32.mrf.mxu1  ;;  %v1324_v9 = vrot.slane %v1169_v34, 4 }
 0x2e3   :  { %v1310_v21 = vrot.slane %v1192_v24, 4 }
 0x2e7   :  { %v1146_v3 = vpop.f32.mrf.mxu3 }
 0x2e8   :  { %v1311_v26 = vsel %vm113_vm1, %v1310_v21, %v1146_v3  ;;  %v1312_v38 = vrot.slane %v1146_v3, 4  ;;  %v1215_v62 = vpop.f32.mrf.mxu2 }
 0x2e9   :  { %v1317_v1 = vperm.slane %v1311_v26, %v2076_v20  ;;  %v1322_v39 = vrot.slane %v1215_v62, 4  ;;  %v1325_v30 = vsel %vm113_vm1, %v1215_v62, %v1324_v9 }
 0x2ea   :  { %v1313_v37 = vsel %vm113_vm1, %v1192_v24, %v1312_v38  ;;  %v1333_v11 = vperm.slane %v1325_v30, %v2076_v20 }
 0x2eb   :  { %v1321_v0 = vperm.slane %v1313_v37, %v2076_v20  ;;  %v1336_v22 = vrot.slane %v1317_v1, 4  ;;  %v1323_v44 = vsel %vm113_vm1, %v1322_v39, %v1169_v34 }
 0x2ec   :  { %v1329_v2 = vperm.slane %v1323_v44, %v2076_v20  ;;  %v1346_v40 = vrot.slane %v1333_v11, 4 }
 0x2ed   :  { %v1348_v63 = vrot.slane %v1321_v0, 4 }
 0x2ee   :  { %v1334_v14 = vrot.slane %v1329_v2, 4  ;;  %v1337_v35 = vsel %vm113_vm1, %v1329_v2, %v1336_v22  ;;  %v1347_v46 = vsel %vm113_vm1, %v1346_v40, %v1321_v0 }
 0x2ef   :  { %v1345_v43 = vperm.slane %v1337_v35, %v2090_v32  ;;  %v1349_v42 = vsel %vm113_vm1, %v1333_v11, %v1348_v63  ;;  %v1353_v48 = vperm.slane %v1347_v46, %v2090_v32 }
 0x2f0   :  { %v1335_v27 = vsel %vm113_vm1, %v1334_v14, %v1317_v1  ;;  %v1357_v52 = vperm.slane %v1349_v42, %v2090_v32 }
 0x2f1   :  { %v1341_v56 = vperm.slane %v1335_v27, %v2090_v32  ;;  %v1360_v41 = vrot.slane %v1345_v43, 4  ;;  %v1362_v50 = vrot.slane %v1353_v48, 4  ;;  %v1261_v8 = vpop.f32.mrf.mxu0 }
 0x2f2   :  { %v1364_v59 = vrot.slane %v1357_v52, 4  ;;  %v1284_v49 = vpop.f32.mrf.mxu1  ;;  %v1380_v5 = vrot.slane %v1261_v8, 4 }
 0x2f3   :  { %v1358_v23 = vrot.slane %v1341_v56, 4  ;;  %v1361_v45 = vsel %vm113_vm1, 0.0, %v1360_v41  ;;  %v1422_v36 = vsel %vm113_vm1, %v1360_v41, %v1341_v56  ;;  %v1366_v13 = vrot.slane %v1284_v49, 4 }
 0x2f4   :  { %v1365_v29 = vsel %vm113_vm1, 0.0, %v1364_v59  ;;  %v1427_v57 = vrot.slane %v1361_v45, 4  ;;  %v1433_v60 = vsel %vm113_vm1, %v1364_v59, %v1353_v48  ;;  %v1426_v18 = vperm.slane %v1422_v36, %v2076_v20 }
 0x2f5   :  { %v1438_v17 = vrot.slane %v1365_v29, 4  ;;  %v1359_v25 = vsel %vm113_vm1, 0.0, %v1358_v23  ;;  %v1437_v4 = vperm.slane %v1433_v60, %v2076_v20  ;;  %v1363_v10 = vsel %vm113_vm1, 0.0, %v1362_v50 }
 0x2f6   :  { %v1428_v7 = vsel %vm113_vm1, %v1427_v57, %v1359_v25  ;;  %v1446_v61 = vrot.slane %v1426_v18, 4 }
 0x2f7   :  { %v1238_v6 = vpop.f32.mrf.mxu3  ;;  %v1432_v55 = vperm.slane %v1428_v7, %v2076_v20  ;;  %v1439_v12 = vsel %vm113_vm1, %v1438_v17, %v1363_v10  ;;  %v1458_v31 = vrot.slane %v1437_v4, 4 }
 0x2f8   :  { %v1367_v51 = vsel %vm113_vm1, %v1366_v13, %v1238_v6  ;;  %v1368_v15 = vrot.slane %v1238_v6, 4  ;;  %v1307_v16 = vpop.f32.mrf.mxu2  ;;  %v1443_v33 = vperm.slane %v1439_v12, %v2076_v20 }
 0x2f9   :  { %v1373_v19 = vperm.slane %v1367_v51, %v2076_v20  ;;  %v1378_v28 = vrot.slane %v1307_v16, 4  ;;  %v1381_v47 = vsel %vm113_vm1, %v1307_v16, %v1380_v5  ;;  %v1447_v58 = vsel %vm113_vm1, %v1432_v55, %v1446_v61 }
 0x2fa   :  { %v1369_v53 = vsel %vm113_vm1, %v1284_v49, %v1368_v15  ;;  %v1389_v54 = vperm.slane %v1381_v47, %v2076_v20  ;;  %v1455_v9 = vperm.slane %v1447_v58, %v2090_v32  ;;  %v1459_v38 = vsel %vm113_vm1, %v1443_v33, %v1458_v31 }
 0x2fb   :  { %v1377_v24 = vperm.slane %v1369_v53, %v2076_v20  ;;  %v1392_v34 = vrot.slane %v1373_v19, 4  ;;  %v1379_v21 = vsel %vm113_vm1, %v1378_v28, %v1261_v8  ;;  %v1444_v62 = vrot.slane %v1432_v55, 4 }
 0x2fc   :  { %v1385_v3 = vperm.slane %v1379_v21, %v2076_v20  ;;  %v1402_v26 = vrot.slane %v1389_v54, 4  ;;  %v1467_v39 = vperm.slane %v1459_v38, %v2090_v32  ;;  %v1474_v30 = vrot.slane %v1455_v9, 4 }
 0x2fd   :  { %v1404_v1 = vrot.slane %v1377_v24, 4  ;;  %v1456_v37 = vrot.slane %v1443_v33, 4  ;;  %v1445_v44 = vsel %vm113_vm1, %v1444_v62, %v1426_v18  ;;  %v1564_v62 = vld [vmem:[%s2697_s2 + $0x10] sm:$0xff] }
 0x2fe   :  { %v1390_v11 = vrot.slane %v1385_v3, 4  ;;  %v1393_v0 = vsel %vm113_vm1, %v1385_v3, %v1392_v34  ;;  %v1403_v22 = vsel %vm113_vm1, %v1402_v26, %v1377_v24  ;;  %v1475_v14 = vsel %vm113_vm1, %v1467_v39, %v1474_v30 }
 0x2ff   :  { %v1401_v2 = vperm.slane %v1393_v0, %v2090_v32  ;;  %v1405_v40 = vsel %vm113_vm1, %v1389_v54, %v1404_v1  ;;  %v1409_v63 = vperm.slane %v1403_v22, %v2090_v32  ;;  %1548 = vrot.lane.b32.xlu2 %v1475_v14, %s1993_s19  ;;  %v1472_v43 = vrot.slane %v1467_v39, 4  ;;  %v1563_v1 = vld [vmem:[%s2697_s2 + $0x8] sm:$0xff]  ;;  %v1562_v39 = vld [vmem:[%s2697_s2] sm:$0xff] }
 0x300   :  { %v1391_v35 = vsel %vm113_vm1, %v1390_v11, %v1373_v19  ;;  %v1413_v46 = vperm.slane %v1405_v40, %v2090_v32  ;;  %v1451_v42 = vperm.slane %v1445_v44, %v2090_v32  ;;  %v1457_v56 = vsel %vm113_vm1, %v1456_v37, %v1437_v4 }
 0x301   :  { %v1397_v48 = vperm.slane %v1391_v35, %v2090_v32  ;;  %v1416_v27 = vrot.slane %v1401_v2, 4  ;;  %v1418_v52 = vrot.slane %v1409_v63, 4  ;;  %v1473_v50 = vsel %vm113_vm1, %v1472_v43, %v1455_v9  ;;  %v2622_v43 = vld [vmem:[#allocation5] sm:$0xff] }
 0x302   :  { %v1420_v41 = vrot.slane %v1413_v46, 4  ;;  %v1463_v59 = vperm.slane %v1457_v56, %v2090_v32  ;;  %v1470_v49 = vrot.slane %v1451_v42, 4  ;;  %1540 = vrot.lane.b32.xlu1 %v1473_v50, %s1994_s20 }
 0x303   :  { %v1414_v23 = vrot.slane %v1397_v48, 4  ;;  %v1417_v45 = vsel %vm113_vm1, 0.0, %v1416_v27  ;;  %v1476_v8 = vsel %vm113_vm1, %v1416_v27, %v1397_v48  ;;  %v1419_v4 = vsel %vm113_vm1, 0.0, %v1418_v52  ;;  %v1902_v52 = vld [vmem:[#allocation2] sm:$0xff] }
 0x304   :  { %v1421_v36 = vsel %vm113_vm1, 0.0, %v1420_v41  ;;  %v1481_v29 = vrot.slane %v1417_v45, 4  ;;  %v1487_v57 = vsel %vm113_vm1, %v1420_v41, %v1409_v63  ;;  %v1468_v60 = vrot.slane %v1463_v59, 4 }
 0x305   :  { %v1492_v18 = vrot.slane %v1421_v36, 4  ;;  %v1471_v17 = vsel %vm113_vm1, %v1463_v59, %v1470_v49  ;;  %v1415_v13 = vsel %vm113_vm1, 0.0, %v1414_v23  ;;  %v1480_v25 = vperm.slane %v1476_v8, %v2076_v20  ;;  %v1903_v49 = vld [vmem:[#allocation2 + $0x8] sm:$0xff] }
 0x306   :  { %1532 = vrot.lane.b32.xlu0 %v1471_v17, %s1984_s30  ;;  %v1482_v10 = vsel %vm113_vm1, %v1481_v29, %v1415_v13  ;;  %v1491_v5 = vperm.slane %v1487_v57, %v2076_v20  ;;  %v1469_v6 = vsel %vm113_vm1, %v1468_v60, %v1451_v42  ;;  %v1566_v42 = vperm.slane %v2622_v43, 1 }
 0x307   :  { %v1486_v7 = vperm.slane %v1482_v10, %v2076_v20  ;;  %v1493_v61 = vsel %vm113_vm1, %v1492_v18, %v1419_v4  ;;  %v1500_v51 = vrot.slane %v1480_v25, 4  ;;  %v1995_v8 = vmov 32.0  }
 0x308   :  { %v1497_v15 = vperm.slane %v1493_v61, %v2076_v20  ;;  %v1512_v16 = vrot.slane %v1491_v5, 4  ;;  %1891 = vrcp.f32 %v1995_v8 }
 0x309   :  { %v1501_v55 = vsel %vm113_vm1, %v1486_v7, %v1500_v51  ;;  %v1498_v12 = vrot.slane %v1486_v7, 4 }
 0x30a   :  { %v1509_v19 = vperm.slane %v1501_v55, %v2090_v32  ;;  %v1513_v28 = vsel %vm113_vm1, %v1497_v15, %v1512_v16  ;;  %v1510_v47 = vrot.slane %v1497_v15, 4  ;;  %v1658_v16 = vld [vmem:[%s2698_s3 + $0x18] sm:$0xff]  ;;  %v1657_v55 = vld [vmem:[%s2698_s3 + $0x10] sm:$0xff] }
 0x30b   :  { %v1521_v33 = vperm.slane %v1513_v28, %v2090_v32  ;;  %v1499_v53 = vsel %vm113_vm1, %v1498_v12, %v1480_v25  ;;  %1678 = vmatpush.msrb.mxu0 %v1658_v16  ;;  %v1656_v12 = vld [vmem:[%s2698_s3 + $0x8] sm:$0xff] }
 0x30c   :  { %v1528_v54 = vrot.slane %v1509_v19, 4  ;;  %v1505_v58 = vperm.slane %v1499_v53, %v2090_v32  ;;  %v1511_v31 = vsel %vm113_vm1, %v1510_v47, %v1491_v5  ;;  %v1698_v53 = vld [vmem:[%s2699_s4 + $0x38] sm:$0xff] }
 0x30d   :  { %v1526_v24 = vrot.slane %v1521_v33, 4  ;;  %v1517_v20 = vperm.slane %v1511_v31, %v2090_v32  ;;  %v1565_v32 = vld [vmem:[%s2697_s2 + $0x18] sm:$0xff]  ;;  %1679 = vmatpush.msrb.mxu0 %v1657_v55  ;;  %1715 = vmatpush.msra.mxu1 %v1698_v53  ;;  %s1790_s2 = sshll.u32 %s2701_s6, 4  ;;  %s1791_s2 = int_to_ptr.hbm [resolvable:$true] %s1790_s2 }
 0x30e   :  { %v1529_v34 = vsel %vm113_vm1, %v1521_v33, %v1528_v54  ;;  %v1524_v21 = vrot.slane %v1505_v58, 4  ;;  %1585 = vmatpush.msra.mxu3 %v1565_v32  ;;  %v1892_v36 = vpop.eup %1891  ;;  %v1697_v54 = vld [vmem:[%s2699_s4 + $0x30] sm:$0xff] }
 0x30f   :  { %1550 = vrot.lane.b32.xlu2 %v1529_v34, %s1993_s19  ;;  %v1527_v9 = vsel %vm113_vm1, %v1526_v24, %v1509_v19  ;;  %v1522_v3 = vrot.slane %v1517_v20, 4  ;;  %v1605_v29 = vmul.f32 32.0, %v1892_v36  ;;  %vm1609_vm13 = vweird.f32 %v1892_v36  ;;  %1680 = vmatpush.msrb.mxu0 %v1656_v12  ;;  %v1655_v19 = vld [vmem:[%s2698_s3] sm:$0xff] }
 0x310   :  { %1542 = vrot.lane.b32.xlu1 %v1527_v9, %s1994_s20  ;;  %v1525_v26 = vsel %vm113_vm1, %v1517_v20, %v1524_v21  ;;  %1586 = vmatpush.msra.mxu3 %v1564_v62  ;;  %v1695_v21 = vld [vmem:[%s2699_s4 + $0x20] sm:$0xff] }
 0x311   :  { %1534 = vrot.lane.b32.xlu0 %v1525_v26, %s1984_s30  ;;  %v1523_v38 = vsel %vm113_vm1, %v1522_v3, %v1505_v58  ;;  %v1606_v57 = vsub.f32 1.0, %v1605_v29  ;;  %1681 = vmatpush.msrb.mxu0 %v1655_v19  ;;  %v1696_v58 = vld [vmem:[%s2699_s4 + $0x28] sm:$0xff]  ;;  %v1694_v26 = vld [vmem:[%s2699_s4 + $0x18] sm:$0xff] }
 0x312   :  { %1587 = vmatpush.msra.mxu3 %v1563_v1  ;;  %1716 = vmatpush.msra.mxu1 %v1697_v54  ;;  %v1649_v1 = vperm.slane %v2622_v43, 2 }
 0x313   :  { %v1607_v60 = vmul.f32 %v1892_v36, %v1606_v57 }
 0x314   :  { %1588 = vmatpush.msra.mxu3 %v1562_v39  ;;  %1717 = vmatpush.msra.mxu1 %v1696_v58 }
 0x315   :  { %v1608_v18 = vadd.f32 %v1892_v36, %v1607_v60 }
 0x316   :  { %1718 = vmatpush.msra.mxu1 %v1695_v21 }
 0x317   :  { %v2627_v17 = vsel %vm1609_vm13, %v1892_v36, %v1608_v18  ;;  %v1699_v36 = vperm.slane %v2622_v43, 5 }
 0x318   :  { %1719 = vmatpush.msra.mxu1 %v1694_v26 }
 0x359   :  { %v1549_v0 = vpop.permute.xlu2 %1548 }
 0x369   :  { %v1551_v14 = vpop.permute.xlu2 %1550 }
 0x374   :  { %v1541_v30 = vpop.permute.xlu1 %1540 }
 0x378   :  { %v1533_v37 = vpop.permute.xlu0 %1532 }
 0x379   :  { %v1554_v11 = vsel %vm821_vm2, %v1469_v6, %v1533_v37 }
 0x37a   :  { %v1557_v22 = vsel %vm1556_vm11, %v1554_v11, %v1541_v30 }
 0x37b   :  { %v1560_v44 = vsel %vm1559_vm12, %v1557_v22, %v1549_v0  ;;  %v1652_v0 = vperm.slane %v2622_v43, 3 }
 0x37c   :  { %1830 = vmatmul.msk.f32.vlgmr.msra.gmra.mxu3 %vm62_vm0, %v1560_v44 }
 0x382   :  { %v1543_v2 = vpop.permute.xlu1 %1542 }
 0x383   :  { %v1535_v40 = vpop.permute.xlu0 %1534 }
 0x384   :  { %v1555_v63 = vsel %vm821_vm2, %v1523_v38, %v1535_v40 }
 0x385   :  { %v1558_v35 = vsel %vm1556_vm11, %v1555_v63, %v1543_v2 }
 0x386   :  { %v1561_v46 = vsel %vm1559_vm12, %v1558_v35, %v1551_v14 }
 0x387   :  { %1831 = vmatmul.msk.f32.gmra.mxu3 %vm62_vm0, %v1561_v46 }
 0x3ff   :  { %v1590_v48 = vpop.f32.mrf.mxu3 }
 0x400   :  { %v1591_v27 = vadd.f32 %v1590_v48, %v1566_v42 }
 0x402   :  { %v1596_v56 = vadd.f32 %v1902_v52, %v1591_v27  ;;  %v1693_v27 = vld [vmem:[%s2699_s4 + $0x10] sm:$0xff]  ;;  %v1692_v52 = vld [vmem:[%s2699_s4 + $0x8] sm:$0xff] }
 0x403   :  { %1720 = vmatpush.msra.mxu1 %v1693_v27 }
 0x404   :  { %v1598_v41 = vsel %vm62_vm0, %v1596_v56, 0.0 }
 0x405   :  { %1599 = vadd.xlane.f32.xlu0 %v1598_v41  ;;  %1721 = vmatpush.msra.mxu1 %v1692_v52  ;;  %v1659_v41 = vperm.slane %v2622_v43, 4 }
 0x40a   :  { %v1593_v50 = vpop.f32.mrf.mxu3 }
 0x40b   :  { %v1594_v59 = vadd.f32 %v1593_v50, %v1566_v42 }
 0x40d   :  { %v1597_v23 = vadd.f32 %v1903_v49, %v1594_v59 }
 0x40f   :  { %v1601_v45 = vsel %vm62_vm0, %v1597_v23, 0.0 }
 0x410   :  { %1602 = vadd.xlane.f32.xlu1 %v1601_v45 }
 0x478   :  { %v1600_v13 = vpop.xlane.xlu0 %1599 }
 0x479   :  { %v1611_v25 = vmul.f32 %v2627_v17, %v1600_v13 }
 0x47b   :  { %v1613_v4 = vsub.f32 %v1596_v56, %v1611_v25  ;;  %v1691_v56 = vld [vmem:[%s2699_s4] sm:$0xff]  ;;  %s1996_s4 = smov [#allocation7]  }
 0x47c   :  { %1722 = vmatpush.msra.mxu1 %v1691_v56  ;;  %s1788_s26 = sshll.u32 %s1996_s4, 4  ;;  %s1789_s26 = int_to_ptr.vmem [resolvable:$true] %s1788_s26 }
 0x47d   :  { %v1615_v10 = vmul.f32 %v1613_v4, %v1613_v4 }
 0x47f   :  { %v1617_v5 = vsel %vm62_vm0, %v1615_v10, 0.0 }
 0x480   :  { %1618 = vadd.xlane.f32.xlu2 %v1617_v5 }
 0x483   :  { %v1603_v6 = vpop.xlane.xlu1 %1602 }
 0x484   :  { %v1612_v7 = vmul.f32 %v2627_v17, %v1603_v6 }
 0x486   :  { %v1614_v61 = vsub.f32 %v1597_v23, %v1612_v7 }
 0x488   :  { %v1616_v51 = vmul.f32 %v1614_v61, %v1614_v61 }
 0x48a   :  { %v1620_v15 = vsel %vm62_vm0, %v1616_v51, 0.0 }
 0x48b   :  { %1621 = vadd.xlane.f32.xlu2 %v1620_v15 }
 0x4f3   :  { %v1619_v28 = vpop.xlane.xlu2 %1618 }
 0x4f4   :  { %v1623_v47 = vmul.f32 %v1619_v28, %v2627_v17 }
 0x4f6   :  { %v1625_v33 = vadd.f32 1e-05, %v1623_v47 }
 0x4f8   :  { %1893 = vrsqrt.f32 %v1625_v33  ;;  %vm1633_vm15 = vweird.f32 %v1625_v33 }
 0x4fe   :  { %v1894_v31 = vpop.eup %1893  ;;  %v1622_v24 = vpop.xlane.xlu2 %1621 }
 0x4ff   :  { %v1628_v20 = vmul.f32 %v1894_v31, %v1625_v33  ;;  %v1624_v34 = vmul.f32 %v1622_v24, %v2627_v17  ;;  %vm1634_vm14 = vweird.f32 %v1894_v31 }
 0x500   :  { %vm1635_vm1 = vmor %vm1633_vm15, %vm1634_vm14 }
 0x501   :  { %v1629_v9 = vmul.f32 %v1894_v31, %v1628_v20  ;;  %v1626_v3 = vadd.f32 1e-05, %v1624_v34 }
 0x503   :  { %v1630_v38 = vmul.f32 0.5, %v1629_v9  ;;  %1895 = vrsqrt.f32 %v1626_v3  ;;  %vm1643_vm3 = vweird.f32 %v1626_v3 }
 0x505   :  { %v1631_v32 = vsub.f32 1.5, %v1630_v38 }
 0x507   :  { %v1632_v62 = vmul.f32 %v1894_v31, %v1631_v32 }
 0x509   :  { %v1896_v39 = vpop.eup %1895  ;;  %v1636_v30 = vsel %vm1635_vm1, %v1894_v31, %v1632_v62 }
 0x50a   :  { %v1647_v37 = vmul.f32 %v1636_v30, %v1613_v4  ;;  %v1638_v11 = vmul.f32 %v1896_v39, %v1626_v3  ;;  %vm1644_vm2 = vweird.f32 %v1896_v39  ;;  %v1776_v3 = vperm.slane %v2622_v43, 6 }
 0x50b   :  { %vm1645_vm4 = vmor %vm1643_vm3, %vm1644_vm2 }
 0x50c   :  { %v1650_v22 = vmul.f32 %v1649_v1, %v1647_v37  ;;  %v1639_v44 = vmul.f32 %v1896_v39, %v1638_v11 }
 0x50e   :  { %v1640_v2 = vmul.f32 0.5, %v1639_v44  ;;  %v1653_v40 = vadd.f32 %v1652_v0, %v1650_v22 }
 0x510   :  { %v1641_v63 = vsub.f32 1.5, %v1640_v2  ;;  %1832 = vmatmul.msk.f32.vlgmr.msrb.gmra.mxu0 %vm62_vm0, %v1653_v40 }
 0x512   :  { %v1642_v14 = vmul.f32 %v1896_v39, %v1641_v63 }
 0x514   :  { %v1646_v35 = vsel %vm1645_vm4, %v1896_v39, %v1642_v14 }
 0x515   :  { %v1648_v46 = vmul.f32 %v1646_v35, %v1614_v61 }
 0x517   :  { %v1651_v42 = vmul.f32 %v1649_v1, %v1648_v46  ;;  %v1779_v1 = vperm.slane %v2622_v43, 7 }
 0x519   :  { %v1654_v48 = vadd.f32 %v1652_v0, %v1651_v42 }
 0x51b   :  { %1833 = vmatmul.msk.f32.gmra.mxu0 %vm62_vm0, %v1654_v48 }
 0x58d   :  { %v1683_v50 = vpop.f32.mrf.mxu0 }
 0x58e   :  { %v1684_v59 = vadd.f32 %v1683_v50, %v1659_v41 }
 0x590   :  { %v1689_v49 = vmax.f32 %v1684_v59, 0.0 }
 0x592   :  { %1834 = vmatmul.msk.f32.vlgmr.msra.gmra.mxu1 %vm1700_vm5, %v1689_v49 }
 0x598   :  { %v1686_v23 = vpop.f32.mrf.mxu0 }
 0x599   :  { %v1687_v45 = vadd.f32 %v1686_v23, %v1659_v41 }
 0x59b   :  { %v1690_v8 = vmax.f32 %v1687_v45, 0.0 }
 0x59d   :  { %1835 = vmatmul.msk.f32.gmra.mxu1 %vm1700_vm5, %v1690_v8 }
 0x60f   :  { %v1724_v29 = vpop.f32.mrf.mxu1 }
 0x610   :  { %v1725_v57 = vadd.f32 %v1724_v29, %v1699_v36 }
 0x612   :  { %v1730_v60 = vadd.f32 %v1725_v57, %v1653_v40 }
 0x614   :  { %v1732_v18 = vsel %vm62_vm0, %v1730_v60, 0.0 }
 0x615   :  { %1733 = vadd.xlane.f32.xlu0 %v1732_v18 }
 0x61a   :  { %v1727_v13 = vpop.f32.mrf.mxu1 }
 0x61b   :  { %v1728_v25 = vadd.f32 %v1727_v13, %v1699_v36 }
 0x61d   :  { %v1731_v4 = vadd.f32 %v1728_v25, %v1654_v48 }
 0x61f   :  { %v1735_v10 = vsel %vm62_vm0, %v1731_v4, 0.0 }
 0x620   :  { %1736 = vadd.xlane.f32.xlu1 %v1735_v10 }
 0x688   :  { %v1734_v5 = vpop.xlane.xlu0 %1733 }
 0x689   :  { %v1738_v6 = vmul.f32 %v1734_v5, %v2627_v17 }
 0x68b   :  { %v1740_v7 = vsub.f32 %v1730_v60, %v1738_v6 }
 0x68d   :  { %v1742_v61 = vmul.f32 %v1740_v7, %v1740_v7 }
 0x68f   :  { %v1744_v51 = vsel %vm62_vm0, %v1742_v61, 0.0 }
 0x690   :  { %1745 = vadd.xlane.f32.xlu2 %v1744_v51 }
 0x693   :  { %v1737_v15 = vpop.xlane.xlu1 %1736 }
 0x694   :  { %v1739_v16 = vmul.f32 %v1737_v15, %v2627_v17 }
 0x696   :  { %v1741_v55 = vsub.f32 %v1731_v4, %v1739_v16 }
 0x698   :  { %v1743_v12 = vmul.f32 %v1741_v55, %v1741_v55 }
 0x69a   :  { %v1747_v19 = vsel %vm62_vm0, %v1743_v12, 0.0 }
 0x69b   :  { %1748 = vadd.xlane.f32.xlu0 %v1747_v19 }
 0x703   :  { %v1746_v28 = vpop.xlane.xlu2 %1745 }
 0x704   :  { %v1750_v47 = vmul.f32 %v1746_v28, %v2627_v17 }
 0x706   :  { %v1752_v33 = vadd.f32 1e-05, %v1750_v47 }
 0x708   :  { %1897 = vrsqrt.f32 %v1752_v33  ;;  %vm1760_vm7 = vweird.f32 %v1752_v33 }
 0x70e   :  { %v1898_v53 = vpop.eup %1897  ;;  %v1749_v54 = vpop.xlane.xlu0 %1748 }
 0x70f   :  { %v1755_v58 = vmul.f32 %v1898_v53, %v1752_v33  ;;  %v1751_v31 = vmul.f32 %v1749_v54, %v2627_v17  ;;  %vm1761_vm6 = vweird.f32 %v1898_v53 }
 0x710   :  { %vm1762_vm8 = vmor %vm1760_vm7, %vm1761_vm6 }
 0x711   :  { %v1756_v24 = vmul.f32 %v1898_v53, %v1755_v58  ;;  %v1753_v20 = vadd.f32 1e-05, %v1751_v31 }
 0x713   :  { %v1757_v34 = vmul.f32 0.5, %v1756_v24  ;;  %1899 = vrsqrt.f32 %v1753_v20  ;;  %vm1770_vm10 = vweird.f32 %v1753_v20 }
 0x715   :  { %v1758_v21 = vsub.f32 1.5, %v1757_v34 }
 0x717   :  { %v1759_v9 = vmul.f32 %v1898_v53, %v1758_v21 }
 0x719   :  { %v1900_v26 = vpop.eup %1899  ;;  %v1763_v38 = vsel %vm1762_vm8, %v1898_v53, %v1759_v9 }
 0x71a   :  { %v1774_v32 = vmul.f32 %v1763_v38, %v1740_v7  ;;  %v1765_v62 = vmul.f32 %v1900_v26, %v1753_v20  ;;  %vm1771_vm9 = vweird.f32 %v1900_v26 }
 0x71b   :  { %vm1772_vm11 = vmor %vm1770_vm10, %vm1771_vm9 }
 0x71c   :  { %v1777_v39 = vmul.f32 %v1776_v3, %v1774_v32  ;;  %v1766_v30 = vmul.f32 %v1900_v26, %v1765_v62 }
 0x71e   :  { %v1767_v17 = vmul.f32 0.5, %v1766_v30  ;;  %v1780_v37 = vadd.f32 %v1779_v1, %v1777_v39 }
 0x720   :  { %v1768_v11 = vsub.f32 1.5, %v1767_v17  ;;  %1782 = vst.msk [vmem:[#allocation7] sm:$0xff] %vm62_vm0, %v1780_v37 }
 0x722   :  { %v1769_v0 = vmul.f32 %v1900_v26, %v1768_v11 }
 0x724   :  { %v1773_v22 = vsel %vm1772_vm11, %v1900_v26, %v1769_v0 }
 0x725   :  { %v1775_v44 = vmul.f32 %v1773_v22, %v1741_v55 }
 0x727   :  { %v1778_v43 = vmul.f32 %v1776_v3, %v1775_v44 }
 0x729   :  { %v1781_v2 = vadd.f32 %v1779_v1, %v1778_v43 }
 0x72b   :  { %1783 = vst.msk [vmem:[#allocation7 + $0x8] sm:$0xff] %vm62_vm0, %v1781_v2 }
 0x72c   :  { %1796 = dma.vmem_to_hbm [thread:$0]  %s1789_s26, 256, %s1791_s2, [#allocation4], %s1983_s29, %s1983_s29, %s1984_s30  }
 0x72d   :  { %1980 = dma.done.wait [#allocation4], 256  }
 0x72e   :  { %1981 = vsyncadd [#allocation4], 4294967040 }
 0x72f   :  { %1801 = vsyncpa [#allocation3], 1 }
 0x730   :  { %1802 = vsyncpa [#allocation6], 1 }
 0x731   :  { %1803 = vsyncpa [#allocation4], 1 }

</bundles_post_ra>
